<compile_context>
chip_gen: v7x
topology: tpu7x:2x2x1
jax: 0.10.0
libtpu: 0.0.40
codegen_flags: <defaults>
</compile_context>

<pallas_src>
import math
import functools

import jax
import jax.numpy as jnp
from jax.experimental import pallas as pl
from jax.experimental.pallas import tpu as pltpu


# ----------------------------------------------------------------------------
# In-kernel helpers (traced inside the fused Pallas kernel)
# ----------------------------------------------------------------------------
def _layer_norm(x, gamma, beta, eps=1e-5):
    mu = jnp.mean(x, axis=-1, keepdims=True)
    var = jnp.mean((x - mu) ** 2, axis=-1, keepdims=True)
    return (x - mu) * jax.lax.rsqrt(var + eps) * gamma + beta


def _softmax_last(x):
    # approx reciprocal hits the EUP slot; swap to exact division for strict
    # logit-level parity tests.
    m = jnp.max(x, axis=-1, keepdims=True)
    e = jnp.exp(x - m)
    return e * pl.reciprocal(jnp.sum(e, axis=-1, keepdims=True), approx=True)


# ----------------------------------------------------------------------------
# Fused forward kernel: embed (one-hot gather) + PE + L decoder layers + LM head
# ----------------------------------------------------------------------------
def fused_forward_kernel(B, S, D, H, Dh, L, V, scale,
                         tok_ref, emb_ref, pe_ref,
                         wqkv_ref, bqkv_ref, wo_ref, w1_ref, w2_ref,
                         slab_ref, fb1_ref, fcw_ref, fcb_ref,
                         out_ref):
    f32 = jnp.float32
    bf16 = jnp.bfloat16

    # ---- embedding gather (exact one-hot matmul), scale, positional encoding -
    tok = tok_ref[...]                                            # (B*S, 1) int32
    vocab_ids = jax.lax.broadcasted_iota(jnp.int32, (B * S, V), 1)
    onehot = (tok == vocab_ids).astype(f32)                       # (B*S, V)
    emb = jnp.dot(onehot, emb_ref[...], preferred_element_type=f32)   # (B*S, D)
    x = (emb.reshape(B, S, D) * scale + pe_ref[...]).reshape(B * S, D)

    # causal mask (True == masked), built once as (S,S), broadcast over (B*H)
    row = jax.lax.broadcasted_iota(jnp.int32, (S, S), 0)
    col = jax.lax.broadcasted_iota(jnp.int32, (S, S), 1)
    causal = col > row

    slab = slab_ref[...]                                          # (L, 9, D) f32

    for l in range(L):                                            # L static, tiny
        bo = slab[l, 0:1, :]
        cross = slab[l, 1:2, :]
        g1, b1 = slab[l, 2:3, :], slab[l, 3:4, :]
        g2, b2 = slab[l, 4:5, :], slab[l, 5:6, :]
        g3, b3 = slab[l, 6:7, :], slab[l, 7:8, :]
        fb2 = slab[l, 8:9, :]

        # ---- masked multi-head self-attention ---------------------------------
        # one fused batch-wide QKV GEMM (1/sqrt(Dh) already folded into Q cols)
        qkv = jnp.dot(x.astype(bf16), wqkv_ref[l],
                      preferred_element_type=f32) + bqkv_ref[l]   # (B*S, 3D)

        def heads(off):
            # merged (H*B, S, Dh) batch for one batched score/softmax/PV pass
            return jnp.concatenate(
                [qkv[:, off + h * Dh: off + (h + 1) * Dh].reshape(B, S, Dh)
                 for h in range(H)], axis=0)
        q, k, v = heads(0), heads(D), heads(2 * D)

        s = jnp.einsum('bqd,bkd->bqk', q, k,
                       preferred_element_type=f32)                # (H*B, S, S)
        s = jnp.where(causal, -1e30, s)
        p = _softmax_last(s)
        o = jnp.einsum('bqk,bkd->bqd', p, v,
                       preferred_element_type=f32)                # (H*B, S, Dh)

        # re-merge heads along lanes -> (B*S, H*Dh) == concat(heads)
        o = jnp.concatenate([o[h * B:(h + 1) * B].reshape(B * S, Dh)
                             for h in range(H)], axis=1)
        # single out-projection GEMM against unsplit Wo
        sa = jnp.dot(o.astype(bf16), wo_ref[l],
                     preferred_element_type=f32) + bo             # (B*S, D)
        x = _layer_norm(x + sa, g1, b1)

        # ---- cross-attention over all-zeros memory == constant row (exact) ----
        x = _layer_norm(x + cross, g2, b2)

        # ---- position-wise feed-forward (ReLU) ---------------------------------
        h1 = jnp.maximum(
            jnp.dot(x.astype(bf16), w1_ref[l],
                    preferred_element_type=f32) + fb1_ref[l], 0.0)
        ff = jnp.dot(h1.astype(bf16), w2_ref[l],
                     preferred_element_type=f32) + fb2
        x = _layer_norm(x + ff, g3, b3)

    # ---- LM head (vocab zero-padded to 128-lane multiple -> lane-dense store) -
    out_ref[...] = (jnp.dot(x.astype(bf16), fcw_ref[...],
                            preferred_element_type=f32)
                    + fcb_ref[...]).astype(out_ref.dtype)


def _full(shape):
    n = len(shape)
    return pl.BlockSpec(shape, lambda i, _n=n: (0,) * _n)


def forward(kp, tokens, pe_table, d_model, nhead):
    """Full forward in a single pallas_call (incl. the embedding gather)."""
    B, S = tokens.shape
    D, H = d_model, nhead
    Dh = D // H
    L, V, Vp = kp["L"], kp["V"], kp["Vp"]
    FF = kp["w1"].shape[2]

    tok2d = tokens.reshape(B * S, 1).astype(jnp.int32)
    pe = pe_table[:, :S, :]                                       # (1, S, D)

    in_specs = [
        _full((B * S, 1)),                     # tokens
        _full((V, D)),                         # embedding table
        _full((1, S, D)),                      # positional encoding
        _full((L, D, 3 * D)),                  # fused Wqkv (bf16)
        _full((L, 1, 3 * D)),                  # fused qkv bias
        _full((L, D, D)),                      # Wo (bf16)
        _full((L, D, FF)),                     # W1 (bf16)
        _full((L, FF, D)),                     # W2 (bf16)
        _full((L, 9, D)),                      # packed small-param slab
        _full((L, 1, FF)),                     # fb1
        _full((D, Vp)),                        # LM-head W (padded, bf16)
        _full((1, Vp)),                        # LM-head b (padded)
    ]
    out = pl.pallas_call(
        functools.partial(fused_forward_kernel, B, S, D, H, Dh, L, V,
                          math.sqrt(D)),
        out_shape=jax.ShapeDtypeStruct((B * S, Vp), jnp.float32),
        grid=(1,),
        in_specs=in_specs,
        out_specs=_full((B * S, Vp)),
        compiler_params=pltpu.CompilerParams(dimension_semantics=("arbitrary",)),
    )(tok2d, kp["embedding"], pe,
      kp["wqkv"], kp["bqkv"], kp["wo"], kp["w1"], kp["w2"],
      kp["slab"], kp["fb1"], kp["fcw"], kp["fcb"])
    return out.reshape(B, S, Vp)[:, :, :V]


# ----------------------------------------------------------------------------
# Parameters: PyTorch-layout init + one-time kernel-ready preparation
# ----------------------------------------------------------------------------
def build_pe(max_len, d_model):
    position = jnp.arange(max_len, dtype=jnp.float32)[:, None]
    div_term = jnp.exp(jnp.arange(0, d_model, 2, dtype=jnp.float32)
                       * (-math.log(10000.0) / d_model))
    pe = jnp.zeros((max_len, d_model), jnp.float32)
    pe = pe.at[:, 0::2].set(jnp.sin(position * div_term))
    pe = pe.at[:, 1::2].set(jnp.cos(position * div_term))
    return pe[None]  # (1, max_len, d_model)


def init_params(key, vocab, d_model, nhead, num_layers, ff):
    """PyTorch-equivalent parameters; linear weights pre-transposed to (in, out)."""
    def dense(k, shape, scale=0.02):
        return (scale * jax.random.normal(k, shape)).astype(jnp.float32)

    keys = jax.random.split(key, 2 + num_layers)
    D = d_model
    emb = dense(keys[0], (vocab, D), 1.0 / math.sqrt(D))
    emb = emb.at[0].set(0.0)  # padding_idx=0 row is zero in nn.Embedding

    layers = []
    for l in range(num_layers):
        lk = jax.random.split(keys[2 + l], 12)
        layers.append(dict(
            wqkv_s=dense(lk[0], (D, 3 * D)), bqkv_s=dense(lk[1], (1, 3 * D)),
            wo_s=dense(lk[2], (D, D)),       bo_s=dense(lk[3], (1, D)),
            wqkv_c=dense(lk[4], (D, 3 * D)), bqkv_c=dense(lk[5], (1, 3 * D)),
            wo_c=dense(lk[6], (D, D)),       bo_c=dense(lk[7], (1, D)),
            g1=jnp.ones((1, D), jnp.float32), b1=jnp.zeros((1, D), jnp.float32),
            g2=jnp.ones((1, D), jnp.float32), b2=jnp.zeros((1, D), jnp.float32),
            g3=jnp.ones((1, D), jnp.float32), b3=jnp.zeros((1, D), jnp.float32),
            w1=dense(lk[8], (D, ff)),  fb1=dense(lk[9], (1, ff)),
            w2=dense(lk[10], (ff, D)), fb2=dense(lk[11], (1, D)),
        ))
    fc_w = dense(keys[1], (D, vocab))
    fc_b = jnp.zeros((1, vocab), jnp.float32)
    return dict(embedding=emb, layers=layers, fc_w=fc_w, fc_b=fc_b)


def prepare_kernel_params(params, d_model, nhead):
    """One-time host-side conversion into kernel-ready, packed, stacked arrays."""
    D, H = d_model, nhead
    Dh = D // H
    L = len(params["layers"])
    q_scale = 1.0 / math.sqrt(Dh)

    wqkv, bqkv, wo, w1, w2, fb1, slab = [], [], [], [], [], [], []
    for p in params["layers"]:
        # fold 1/sqrt(Dh) into the Q columns / bias (exact)
        wqkv.append(jnp.concatenate(
            [p["wqkv_s"][:, :D] * q_scale, p["wqkv_s"][:, D:]], axis=1))
        bqkv.append(jnp.concatenate(
            [p["bqkv_s"][:, :D] * q_scale, p["bqkv_s"][:, D:]], axis=1))
        wo.append(p["wo_s"])
        w1.append(p["w1"])
        w2.append(p["w2"])
        fb1.append(p["fb1"])
        # Cross-attention with memory == zeros is exactly uniform attention over
        # identical V rows: output = b_v(cross) @ W_o(cross) + b_o(cross).
        # Only valid because the reference always passes torch.zeros_like(x).
        bv_c = p["bqkv_c"][:, 2 * D:3 * D]
        cross = bv_c @ p["wo_c"] + p["bo_c"]
        slab.append(jnp.concatenate(
            [p["bo_s"], cross, p["g1"], p["b1"], p["g2"], p["b2"],
             p["g3"], p["b3"], p["fb2"]], axis=0))                # (9, D)

    kp = dict(
        wqkv=jnp.stack(wqkv).astype(jnp.bfloat16),                # (L, D, 3D)
        bqkv=jnp.stack(bqkv)[:, None, :].reshape(L, 1, 3 * D),    # (L, 1, 3D) f32
        wo=jnp.stack(wo).astype(jnp.bfloat16),                    # (L, D, D)
        w1=jnp.stack(w1).astype(jnp.bfloat16),                    # (L, D, FF)
        w2=jnp.stack(w2).astype(jnp.bfloat16),                    # (L, FF, D)
        fb1=jnp.stack(fb1),                                       # (L, 1, FF) f32
        slab=jnp.stack(slab),                                     # (L, 9, D)  f32
    )
    V = params["fc_w"].shape[1]
    Vp = ((V + 127) // 128) * 128          # lane-dense LM-head / output width
    kp["fcw"] = jnp.pad(params["fc_w"], ((0, 0), (0, Vp - V))).astype(jnp.bfloat16)
    kp["fcb"] = jnp.pad(params["fc_b"], ((0, 0), (0, Vp - V)))
    kp["embedding"] = params["embedding"]                         # (V, D) f32
    kp["V"], kp["Vp"], kp["L"] = V, Vp, L
    return kp


if __name__ == "__main__":
    # Small shapes consistent with the module: vocab=64, d_model=32, nhead=4,
    # num_layers=2, dim_feedforward=64, max_seq_length=16, batch=2, seq=8.
    vocab, d_model, nhead, num_layers, ff, max_len = 64, 32, 4, 2, 64, 16
    B, S = 2, 8

    key = jax.random.PRNGKey(0)
    params = init_params(key, vocab, d_model, nhead, num_layers, ff)
    kp = prepare_kernel_params(params, d_model, nhead)     # one-time prep
    pe_table = build_pe(max_len, d_model)                  # built once, reused
    tokens = jax.random.randint(jax.random.fold_in(key, 123), (B, S), 0, vocab)

    logits = forward(kp, tokens, pe_table, d_model, nhead)
    logits = jax.block_until_ready(logits)
    assert logits.shape == (B, S, vocab)
    assert bool(jnp.all(jnp.isfinite(logits)))
    print("KERNEL_OK")
</pallas_src>

<mosaic_0001>
module attributes {stable_mosaic.version = 11 : i64} {
  func.func @fused_forward_kernel(%arg0: i32, %arg1: memref<16x1xi32, #tpu.memory_space<vmem>>, %arg2: memref<64x32xf32, #tpu.memory_space<vmem>>, %arg3: memref<1x8x32xf32, #tpu.memory_space<vmem>>, %arg4: memref<2x32x96xbf16, #tpu.memory_space<vmem>>, %arg5: memref<2x1x96xf32, #tpu.memory_space<vmem>>, %arg6: memref<2x32x32xbf16, #tpu.memory_space<vmem>>, %arg7: memref<2x32x64xbf16, #tpu.memory_space<vmem>>, %arg8: memref<2x64x32xbf16, #tpu.memory_space<vmem>>, %arg9: memref<2x9x32xf32, #tpu.memory_space<vmem>>, %arg10: memref<2x1x64xf32, #tpu.memory_space<vmem>>, %arg11: memref<32x128xbf16, #tpu.memory_space<vmem>>, %arg12: memref<1x128xf32, #tpu.memory_space<vmem>>, %arg13: memref<16x128xf32, #tpu.memory_space<vmem>>) attributes {dimension_semantics = [#tpu.dimension_semantics<arbitrary>], iteration_bounds = array<i64: 1>, scalar_prefetch = 0 : i64, scratch_operands = 0 : i64, tpu.core_type = #tpu.core_type<tc>, window_params = [{pipeline_mode = #tpu.pipeline_mode<synchronous>, transform_indices = @transform_0, window_bounds = array<i64: 16, 1>}, {pipeline_mode = #tpu.pipeline_mode<synchronous>, transform_indices = @transform_1, window_bounds = array<i64: 64, 32>}, {pipeline_mode = #tpu.pipeline_mode<synchronous>, transform_indices = @transform_2, window_bounds = array<i64: 1, 8, 32>}, {pipeline_mode = #tpu.pipeline_mode<synchronous>, transform_indices = @transform_3, window_bounds = array<i64: 2, 32, 96>}, {pipeline_mode = #tpu.pipeline_mode<synchronous>, transform_indices = @transform_4, window_bounds = array<i64: 2, 1, 96>}, {pipeline_mode = #tpu.pipeline_mode<synchronous>, transform_indices = @transform_5, window_bounds = array<i64: 2, 32, 32>}, {pipeline_mode = #tpu.pipeline_mode<synchronous>, transform_indices = @transform_6, window_bounds = array<i64: 2, 32, 64>}, {pipeline_mode = #tpu.pipeline_mode<synchronous>, transform_indices = @transform_7, window_bounds = array<i64: 2, 64, 32>}, {pipeline_mode = #tpu.pipeline_mode<synchronous>, transform_indices = @transform_8, window_bounds = array<i64: 2, 9, 32>}, {pipeline_mode = #tpu.pipeline_mode<synchronous>, transform_indices = @transform_9, window_bounds = array<i64: 2, 1, 64>}, {pipeline_mode = #tpu.pipeline_mode<synchronous>, transform_indices = @transform_10, window_bounds = array<i64: 32, 128>}, {pipeline_mode = #tpu.pipeline_mode<synchronous>, transform_indices = @transform_11, window_bounds = array<i64: 1, 128>}, {pipeline_mode = #tpu.pipeline_mode<synchronous>, transform_indices = @transform_12, window_bounds = array<i64: 16, 128>}]} {
    %c0 = arith.constant 0 : index
    %c0_0 = arith.constant 0 : index
    %0 = vector.load %arg1[%c0, %c0_0] : memref<16x1xi32, #tpu.memory_space<vmem>>, vector<16x1xi32>
    %1 = tpu.iota {dimensions = array<i32: 1>} : vector<16x64xi32>
    %2 = vector.broadcast %0 : vector<16x1xi32> to vector<16x64xi32>
    %3 = arith.cmpi eq, %2, %1 : vector<16x64xi32>
    %4 = arith.extui %3 : vector<16x64xi1> to vector<16x64xi32>
    %5 = arith.sitofp %4 : vector<16x64xi32> to vector<16x64xf32>
    %c0_1 = arith.constant 0 : index
    %c0_2 = arith.constant 0 : index
    %6 = vector.load %arg2[%c0_1, %c0_2] : memref<64x32xf32, #tpu.memory_space<vmem>>, vector<64x32xf32>
    %cst = arith.constant dense<0.000000e+00> : vector<16x32xf32>
    %7 = tpu.matmul %5, %6, %cst {dimension_numbers = #tpu.dot_dimension_numbers<[1], [0], [0], [1], [0, 0, 1, 1], [], []>} : vector<16x64xf32>, vector<64x32xf32>, vector<16x32xf32> -> vector<16x32xf32>
    %8 = vector.shape_cast %7 : vector<16x32xf32> to vector<2x8x32xf32>
    %cst_3 = arith.constant 5.65685415 : f32
    %9 = vector.broadcast %cst_3 : f32 to vector<2x8x32xf32>
    %10 = arith.mulf %8, %9 : vector<2x8x32xf32>
    %c0_4 = arith.constant 0 : index
    %c0_5 = arith.constant 0 : index
    %c0_6 = arith.constant 0 : index
    %11 = vector.load %arg3[%c0_4, %c0_5, %c0_6] : memref<1x8x32xf32, #tpu.memory_space<vmem>>, vector<1x8x32xf32>
    %12 = vector.broadcast %11 : vector<1x8x32xf32> to vector<2x8x32xf32>
    %13 = arith.addf %10, %12 : vector<2x8x32xf32>
    %14 = vector.shape_cast %13 : vector<2x8x32xf32> to vector<16x32xf32>
    %15 = tpu.iota {dimensions = array<i32: 0>} : vector<8x8xi32>
    %16 = tpu.iota {dimensions = array<i32: 1>} : vector<8x8xi32>
    %17 = arith.cmpi sgt, %16, %15 : vector<8x8xi32>
    %c0_7 = arith.constant 0 : index
    %c0_8 = arith.constant 0 : index
    %c0_9 = arith.constant 0 : index
    %18 = vector.load %arg9[%c0_7, %c0_8, %c0_9] : memref<2x9x32xf32, #tpu.memory_space<vmem>>, vector<2x9x32xf32>
    %19 = vector.extract_strided_slice %18 {offsets = [0, 0, 0], sizes = [1, 1, 32], strides = [1, 1, 1]} : vector<2x9x32xf32> to vector<1x1x32xf32>
    %20 = vector.shape_cast %19 : vector<1x1x32xf32> to vector<1x32xf32>
    %21 = vector.extract_strided_slice %18 {offsets = [0, 1, 0], sizes = [1, 1, 32], strides = [1, 1, 1]} : vector<2x9x32xf32> to vector<1x1x32xf32>
    %22 = vector.shape_cast %21 : vector<1x1x32xf32> to vector<1x32xf32>
    %23 = vector.extract_strided_slice %18 {offsets = [0, 2, 0], sizes = [1, 1, 32], strides = [1, 1, 1]} : vector<2x9x32xf32> to vector<1x1x32xf32>
    %24 = vector.shape_cast %23 : vector<1x1x32xf32> to vector<1x32xf32>
    %25 = vector.extract_strided_slice %18 {offsets = [0, 3, 0], sizes = [1, 1, 32], strides = [1, 1, 1]} : vector<2x9x32xf32> to vector<1x1x32xf32>
    %26 = vector.shape_cast %25 : vector<1x1x32xf32> to vector<1x32xf32>
    %27 = vector.extract_strided_slice %18 {offsets = [0, 4, 0], sizes = [1, 1, 32], strides = [1, 1, 1]} : vector<2x9x32xf32> to vector<1x1x32xf32>
    %28 = vector.shape_cast %27 : vector<1x1x32xf32> to vector<1x32xf32>
    %29 = vector.extract_strided_slice %18 {offsets = [0, 5, 0], sizes = [1, 1, 32], strides = [1, 1, 1]} : vector<2x9x32xf32> to vector<1x1x32xf32>
    %30 = vector.shape_cast %29 : vector<1x1x32xf32> to vector<1x32xf32>
    %31 = vector.extract_strided_slice %18 {offsets = [0, 6, 0], sizes = [1, 1, 32], strides = [1, 1, 1]} : vector<2x9x32xf32> to vector<1x1x32xf32>
    %32 = vector.shape_cast %31 : vector<1x1x32xf32> to vector<1x32xf32>
    %33 = vector.extract_strided_slice %18 {offsets = [0, 7, 0], sizes = [1, 1, 32], strides = [1, 1, 1]} : vector<2x9x32xf32> to vector<1x1x32xf32>
    %34 = vector.shape_cast %33 : vector<1x1x32xf32> to vector<1x32xf32>
    %35 = vector.extract_strided_slice %18 {offsets = [0, 8, 0], sizes = [1, 1, 32], strides = [1, 1, 1]} : vector<2x9x32xf32> to vector<1x1x32xf32>
    %36 = vector.shape_cast %35 : vector<1x1x32xf32> to vector<1x32xf32>
    %37 = arith.truncf %14 : vector<16x32xf32> to vector<16x32xbf16>
    %c0_10 = arith.constant 0 : index
    %c0_11 = arith.constant 0 : index
    %c0_12 = arith.constant 0 : index
    %38 = vector.load %arg4[%c0_10, %c0_11, %c0_12] : memref<2x32x96xbf16, #tpu.memory_space<vmem>>, vector<1x32x96xbf16>
    %39 = vector.shape_cast %38 : vector<1x32x96xbf16> to vector<32x96xbf16>
    %cst_13 = arith.constant dense<0.000000e+00> : vector<16x96xf32>
    %40 = tpu.matmul %37, %39, %cst_13 {dimension_numbers = #tpu.dot_dimension_numbers<[1], [0], [0], [1], [0, 0, 1, 1], [], []>} : vector<16x32xbf16>, vector<32x96xbf16>, vector<16x96xf32> -> vector<16x96xf32>
    %c0_14 = arith.constant 0 : index
    %c0_15 = arith.constant 0 : index
    %c0_16 = arith.constant 0 : index
    %41 = vector.load %arg5[%c0_14, %c0_15, %c0_16] : memref<2x1x96xf32, #tpu.memory_space<vmem>>, vector<1x1x96xf32>
    %42 = vector.shape_cast %41 : vector<1x1x96xf32> to vector<1x96xf32>
    %43 = vector.broadcast %42 : vector<1x96xf32> to vector<16x96xf32>
    %44 = arith.addf %40, %43 : vector<16x96xf32>
    %45 = vector.extract_strided_slice %44 {offsets = [0, 0], sizes = [16, 8], strides = [1, 1]} : vector<16x96xf32> to vector<16x8xf32>
    %46 = vector.shape_cast %45 : vector<16x8xf32> to vector<2x8x8xf32>
    %47 = vector.extract_strided_slice %44 {offsets = [0, 8], sizes = [16, 8], strides = [1, 1]} : vector<16x96xf32> to vector<16x8xf32>
    %48 = vector.shape_cast %47 : vector<16x8xf32> to vector<2x8x8xf32>
    %49 = vector.extract_strided_slice %44 {offsets = [0, 16], sizes = [16, 8], strides = [1, 1]} : vector<16x96xf32> to vector<16x8xf32>
    %50 = vector.shape_cast %49 : vector<16x8xf32> to vector<2x8x8xf32>
    %51 = vector.extract_strided_slice %44 {offsets = [0, 24], sizes = [16, 8], strides = [1, 1]} : vector<16x96xf32> to vector<16x8xf32>
    %52 = vector.shape_cast %51 : vector<16x8xf32> to vector<2x8x8xf32>
    %53 = tpu.concatenate %46, %48, %50, %52 in 0 : vector<2x8x8xf32>, vector<2x8x8xf32>, vector<2x8x8xf32>, vector<2x8x8xf32> -> vector<8x8x8xf32>
    %54 = vector.extract_strided_slice %44 {offsets = [0, 32], sizes = [16, 8], strides = [1, 1]} : vector<16x96xf32> to vector<16x8xf32>
    %55 = vector.shape_cast %54 : vector<16x8xf32> to vector<2x8x8xf32>
    %56 = vector.extract_strided_slice %44 {offsets = [0, 40], sizes = [16, 8], strides = [1, 1]} : vector<16x96xf32> to vector<16x8xf32>
    %57 = vector.shape_cast %56 : vector<16x8xf32> to vector<2x8x8xf32>
    %58 = vector.extract_strided_slice %44 {offsets = [0, 48], sizes = [16, 8], strides = [1, 1]} : vector<16x96xf32> to vector<16x8xf32>
    %59 = vector.shape_cast %58 : vector<16x8xf32> to vector<2x8x8xf32>
    %60 = vector.extract_strided_slice %44 {offsets = [0, 56], sizes = [16, 8], strides = [1, 1]} : vector<16x96xf32> to vector<16x8xf32>
    %61 = vector.shape_cast %60 : vector<16x8xf32> to vector<2x8x8xf32>
    %62 = tpu.concatenate %55, %57, %59, %61 in 0 : vector<2x8x8xf32>, vector<2x8x8xf32>, vector<2x8x8xf32>, vector<2x8x8xf32> -> vector<8x8x8xf32>
    %63 = vector.extract_strided_slice %44 {offsets = [0, 64], sizes = [16, 8], strides = [1, 1]} : vector<16x96xf32> to vector<16x8xf32>
    %64 = vector.shape_cast %63 : vector<16x8xf32> to vector<2x8x8xf32>
    %65 = vector.extract_strided_slice %44 {offsets = [0, 72], sizes = [16, 8], strides = [1, 1]} : vector<16x96xf32> to vector<16x8xf32>
    %66 = vector.shape_cast %65 : vector<16x8xf32> to vector<2x8x8xf32>
    %67 = vector.extract_strided_slice %44 {offsets = [0, 80], sizes = [16, 8], strides = [1, 1]} : vector<16x96xf32> to vector<16x8xf32>
    %68 = vector.shape_cast %67 : vector<16x8xf32> to vector<2x8x8xf32>
    %69 = vector.extract_strided_slice %44 {offsets = [0, 88], sizes = [16, 8], strides = [1, 1]} : vector<16x96xf32> to vector<16x8xf32>
    %70 = vector.shape_cast %69 : vector<16x8xf32> to vector<2x8x8xf32>
    %71 = tpu.concatenate %64, %66, %68, %70 in 0 : vector<2x8x8xf32>, vector<2x8x8xf32>, vector<2x8x8xf32>, vector<2x8x8xf32> -> vector<8x8x8xf32>
    "tpu.trace_start"() <{level = 10 : i32, message = "bqd,bkd->bqk"}> : () -> ()
    %cst_17 = arith.constant dense<0.000000e+00> : vector<8x8x8xf32>
    %72 = tpu.matmul %53, %62, %cst_17 {dimension_numbers = #tpu.dot_dimension_numbers<[2], [2], [1], [1], [0, 0, 0, 1, 1, 1], [0], [0]>} : vector<8x8x8xf32>, vector<8x8x8xf32>, vector<8x8x8xf32> -> vector<8x8x8xf32>
    %cst_18 = arith.constant -1.000000e+30 : f32
    "tpu.trace_stop"() : () -> ()
    %73 = vector.shape_cast %17 : vector<8x8xi1> to vector<1x8x8xi1>
    %74 = vector.broadcast %73 : vector<1x8x8xi1> to vector<8x8x8xi1>
    %75 = vector.broadcast %cst_18 : f32 to vector<8x8x8xf32>
    %76 = arith.select %74, %75, %72 : vector<8x8x8xi1>, vector<8x8x8xf32>
    %cst_19 = arith.constant dense<0xFF800000> : vector<8x8xf32>
    %77 = vector.multi_reduction <maximumf>, %76, %cst_19 [2] : vector<8x8x8xf32> to vector<8x8xf32>
    %78 = vector.shape_cast %77 : vector<8x8xf32> to vector<8x8x1xf32>
    %79 = vector.broadcast %78 : vector<8x8x1xf32> to vector<8x8x8xf32>
    %80 = arith.subf %76, %79 : vector<8x8x8xf32>
    %81 = math.exp %80 : vector<8x8x8xf32>
    %cst_20 = arith.constant dense<0.000000e+00> : vector<8x8xf32>
    %82 = vector.multi_reduction <add>, %81, %cst_20 [2] : vector<8x8x8xf32> to vector<8x8xf32>
    %83 = vector.shape_cast %82 : vector<8x8xf32> to vector<8x8x1xf32>
    %84 = tpu.reciprocal %83 {approx = true} : vector<8x8x1xf32> -> vector<8x8x1xf32>
    %85 = vector.broadcast %84 : vector<8x8x1xf32> to vector<8x8x8xf32>
    %86 = arith.mulf %81, %85 : vector<8x8x8xf32>
    "tpu.trace_start"() <{level = 10 : i32, message = "bqk,bkd->bqd"}> : () -> ()
    %cst_21 = arith.constant dense<0.000000e+00> : vector<8x8x8xf32>
    %87 = tpu.matmul %86, %71, %cst_21 {dimension_numbers = #tpu.dot_dimension_numbers<[2], [1], [1], [2], [0, 0, 0, 1, 1, 2], [0], [0]>} : vector<8x8x8xf32>, vector<8x8x8xf32>, vector<8x8x8xf32> -> vector<8x8x8xf32>
    "tpu.trace_stop"() : () -> ()
    %88 = vector.extract_strided_slice %87 {offsets = [0, 0, 0], sizes = [2, 8, 8], strides = [1, 1, 1]} : vector<8x8x8xf32> to vector<2x8x8xf32>
    %89 = vector.shape_cast %88 : vector<2x8x8xf32> to vector<16x8xf32>
    %90 = vector.extract_strided_slice %87 {offsets = [2, 0, 0], sizes = [2, 8, 8], strides = [1, 1, 1]} : vector<8x8x8xf32> to vector<2x8x8xf32>
    %91 = vector.shape_cast %90 : vector<2x8x8xf32> to vector<16x8xf32>
    %92 = vector.extract_strided_slice %87 {offsets = [4, 0, 0], sizes = [2, 8, 8], strides = [1, 1, 1]} : vector<8x8x8xf32> to vector<2x8x8xf32>
    %93 = vector.shape_cast %92 : vector<2x8x8xf32> to vector<16x8xf32>
    %94 = vector.extract_strided_slice %87 {offsets = [6, 0, 0], sizes = [2, 8, 8], strides = [1, 1, 1]} : vector<8x8x8xf32> to vector<2x8x8xf32>
    %95 = vector.shape_cast %94 : vector<2x8x8xf32> to vector<16x8xf32>
    %96 = tpu.concatenate %89, %91, %93, %95 in 1 : vector<16x8xf32>, vector<16x8xf32>, vector<16x8xf32>, vector<16x8xf32> -> vector<16x32xf32>
    %97 = arith.truncf %96 : vector<16x32xf32> to vector<16x32xbf16>
    %c0_22 = arith.constant 0 : index
    %c0_23 = arith.constant 0 : index
    %c0_24 = arith.constant 0 : index
    %98 = vector.load %arg6[%c0_22, %c0_23, %c0_24] : memref<2x32x32xbf16, #tpu.memory_space<vmem>>, vector<1x32x32xbf16>
    %99 = vector.shape_cast %98 : vector<1x32x32xbf16> to vector<32x32xbf16>
    %cst_25 = arith.constant dense<0.000000e+00> : vector<16x32xf32>
    %100 = tpu.matmul %97, %99, %cst_25 {dimension_numbers = #tpu.dot_dimension_numbers<[1], [0], [0], [1], [0, 0, 1, 1], [], []>} : vector<16x32xbf16>, vector<32x32xbf16>, vector<16x32xf32> -> vector<16x32xf32>
    %101 = vector.broadcast %20 : vector<1x32xf32> to vector<16x32xf32>
    %102 = arith.addf %100, %101 : vector<16x32xf32>
    %103 = arith.addf %14, %102 : vector<16x32xf32>
    %cst_26 = arith.constant dense<0.000000e+00> : vector<16xf32>
    %104 = vector.multi_reduction <add>, %103, %cst_26 [1] : vector<16x32xf32> to vector<16xf32>
    %105 = vector.shape_cast %104 : vector<16xf32> to vector<16x1xf32>
    %cst_27 = arith.constant 3.200000e+01 : f32
    %106 = vector.broadcast %cst_27 : f32 to vector<16x1xf32>
    %107 = arith.divf %105, %106 : vector<16x1xf32>
    %108 = vector.broadcast %107 : vector<16x1xf32> to vector<16x32xf32>
    %109 = arith.subf %103, %108 : vector<16x32xf32>
    %110 = arith.mulf %109, %109 : vector<16x32xf32>
    %cst_28 = arith.constant dense<0.000000e+00> : vector<16xf32>
    %111 = vector.multi_reduction <add>, %110, %cst_28 [1] : vector<16x32xf32> to vector<16xf32>
    %112 = vector.shape_cast %111 : vector<16xf32> to vector<16x1xf32>
    %cst_29 = arith.constant 3.200000e+01 : f32
    %113 = vector.broadcast %cst_29 : f32 to vector<16x1xf32>
    %114 = arith.divf %112, %113 : vector<16x1xf32>
    %115 = vector.broadcast %107 : vector<16x1xf32> to vector<16x32xf32>
    %116 = arith.subf %103, %115 : vector<16x32xf32>
    %cst_30 = arith.constant 9.99999974E-6 : f32
    %117 = vector.broadcast %cst_30 : f32 to vector<16x1xf32>
    %118 = arith.addf %114, %117 : vector<16x1xf32>
    %119 = math.rsqrt %118 : vector<16x1xf32>
    %120 = vector.broadcast %119 : vector<16x1xf32> to vector<16x32xf32>
    %121 = arith.mulf %116, %120 : vector<16x32xf32>
    %122 = vector.broadcast %24 : vector<1x32xf32> to vector<16x32xf32>
    %123 = arith.mulf %121, %122 : vector<16x32xf32>
    %124 = vector.broadcast %26 : vector<1x32xf32> to vector<16x32xf32>
    %125 = arith.addf %123, %124 : vector<16x32xf32>
    %126 = vector.broadcast %22 : vector<1x32xf32> to vector<16x32xf32>
    %127 = arith.addf %125, %126 : vector<16x32xf32>
    %cst_31 = arith.constant dense<0.000000e+00> : vector<16xf32>
    %128 = vector.multi_reduction <add>, %127, %cst_31 [1] : vector<16x32xf32> to vector<16xf32>
    %129 = vector.shape_cast %128 : vector<16xf32> to vector<16x1xf32>
    %cst_32 = arith.constant 3.200000e+01 : f32
    %130 = vector.broadcast %cst_32 : f32 to vector<16x1xf32>
    %131 = arith.divf %129, %130 : vector<16x1xf32>
    %132 = vector.broadcast %131 : vector<16x1xf32> to vector<16x32xf32>
    %133 = arith.subf %127, %132 : vector<16x32xf32>
    %134 = arith.mulf %133, %133 : vector<16x32xf32>
    %cst_33 = arith.constant dense<0.000000e+00> : vector<16xf32>
    %135 = vector.multi_reduction <add>, %134, %cst_33 [1] : vector<16x32xf32> to vector<16xf32>
    %136 = vector.shape_cast %135 : vector<16xf32> to vector<16x1xf32>
    %cst_34 = arith.constant 3.200000e+01 : f32
    %137 = vector.broadcast %cst_34 : f32 to vector<16x1xf32>
    %138 = arith.divf %136, %137 : vector<16x1xf32>
    %139 = vector.broadcast %131 : vector<16x1xf32> to vector<16x32xf32>
    %140 = arith.subf %127, %139 : vector<16x32xf32>
    %cst_35 = arith.constant 9.99999974E-6 : f32
    %141 = vector.broadcast %cst_35 : f32 to vector<16x1xf32>
    %142 = arith.addf %138, %141 : vector<16x1xf32>
    %143 = math.rsqrt %142 : vector<16x1xf32>
    %144 = vector.broadcast %143 : vector<16x1xf32> to vector<16x32xf32>
    %145 = arith.mulf %140, %144 : vector<16x32xf32>
    %146 = vector.broadcast %28 : vector<1x32xf32> to vector<16x32xf32>
    %147 = arith.mulf %145, %146 : vector<16x32xf32>
    %148 = vector.broadcast %30 : vector<1x32xf32> to vector<16x32xf32>
    %149 = arith.addf %147, %148 : vector<16x32xf32>
    %150 = arith.truncf %149 : vector<16x32xf32> to vector<16x32xbf16>
    %c0_36 = arith.constant 0 : index
    %c0_37 = arith.constant 0 : index
    %c0_38 = arith.constant 0 : index
    %151 = vector.load %arg7[%c0_36, %c0_37, %c0_38] : memref<2x32x64xbf16, #tpu.memory_space<vmem>>, vector<1x32x64xbf16>
    %152 = vector.shape_cast %151 : vector<1x32x64xbf16> to vector<32x64xbf16>
    %cst_39 = arith.constant dense<0.000000e+00> : vector<16x64xf32>
    %153 = tpu.matmul %150, %152, %cst_39 {dimension_numbers = #tpu.dot_dimension_numbers<[1], [0], [0], [1], [0, 0, 1, 1], [], []>} : vector<16x32xbf16>, vector<32x64xbf16>, vector<16x64xf32> -> vector<16x64xf32>
    %c0_40 = arith.constant 0 : index
    %c0_41 = arith.constant 0 : index
    %c0_42 = arith.constant 0 : index
    %154 = vector.load %arg10[%c0_40, %c0_41, %c0_42] : memref<2x1x64xf32, #tpu.memory_space<vmem>>, vector<1x1x64xf32>
    %155 = vector.shape_cast %154 : vector<1x1x64xf32> to vector<1x64xf32>
    %156 = vector.broadcast %155 : vector<1x64xf32> to vector<16x64xf32>
    %157 = arith.addf %153, %156 : vector<16x64xf32>
    %cst_43 = arith.constant 0.000000e+00 : f32
    %158 = vector.broadcast %cst_43 : f32 to vector<16x64xf32>
    %159 = arith.maximumf %157, %158 : vector<16x64xf32>
    %160 = arith.truncf %159 : vector<16x64xf32> to vector<16x64xbf16>
    %c0_44 = arith.constant 0 : index
    %c0_45 = arith.constant 0 : index
    %c0_46 = arith.constant 0 : index
    %161 = vector.load %arg8[%c0_44, %c0_45, %c0_46] : memref<2x64x32xbf16, #tpu.memory_space<vmem>>, vector<1x64x32xbf16>
    %162 = vector.shape_cast %161 : vector<1x64x32xbf16> to vector<64x32xbf16>
    %cst_47 = arith.constant dense<0.000000e+00> : vector<16x32xf32>
    %163 = tpu.matmul %160, %162, %cst_47 {dimension_numbers = #tpu.dot_dimension_numbers<[1], [0], [0], [1], [0, 0, 1, 1], [], []>} : vector<16x64xbf16>, vector<64x32xbf16>, vector<16x32xf32> -> vector<16x32xf32>
    %164 = vector.broadcast %36 : vector<1x32xf32> to vector<16x32xf32>
    %165 = arith.addf %163, %164 : vector<16x32xf32>
    %166 = arith.addf %149, %165 : vector<16x32xf32>
    %cst_48 = arith.constant dense<0.000000e+00> : vector<16xf32>
    %167 = vector.multi_reduction <add>, %166, %cst_48 [1] : vector<16x32xf32> to vector<16xf32>
    %168 = vector.shape_cast %167 : vector<16xf32> to vector<16x1xf32>
    %cst_49 = arith.constant 3.200000e+01 : f32
    %169 = vector.broadcast %cst_49 : f32 to vector<16x1xf32>
    %170 = arith.divf %168, %169 : vector<16x1xf32>
    %171 = vector.broadcast %170 : vector<16x1xf32> to vector<16x32xf32>
    %172 = arith.subf %166, %171 : vector<16x32xf32>
    %173 = arith.mulf %172, %172 : vector<16x32xf32>
    %cst_50 = arith.constant dense<0.000000e+00> : vector<16xf32>
    %174 = vector.multi_reduction <add>, %173, %cst_50 [1] : vector<16x32xf32> to vector<16xf32>
    %175 = vector.shape_cast %174 : vector<16xf32> to vector<16x1xf32>
    %cst_51 = arith.constant 3.200000e+01 : f32
    %176 = vector.broadcast %cst_51 : f32 to vector<16x1xf32>
    %177 = arith.divf %175, %176 : vector<16x1xf32>
    %178 = vector.broadcast %170 : vector<16x1xf32> to vector<16x32xf32>
    %179 = arith.subf %166, %178 : vector<16x32xf32>
    %cst_52 = arith.constant 9.99999974E-6 : f32
    %180 = vector.broadcast %cst_52 : f32 to vector<16x1xf32>
    %181 = arith.addf %177, %180 : vector<16x1xf32>
    %182 = math.rsqrt %181 : vector<16x1xf32>
    %183 = vector.broadcast %182 : vector<16x1xf32> to vector<16x32xf32>
    %184 = arith.mulf %179, %183 : vector<16x32xf32>
    %185 = vector.broadcast %32 : vector<1x32xf32> to vector<16x32xf32>
    %186 = arith.mulf %184, %185 : vector<16x32xf32>
    %187 = vector.broadcast %34 : vector<1x32xf32> to vector<16x32xf32>
    %188 = arith.addf %186, %187 : vector<16x32xf32>
    %189 = vector.extract_strided_slice %18 {offsets = [1, 0, 0], sizes = [1, 1, 32], strides = [1, 1, 1]} : vector<2x9x32xf32> to vector<1x1x32xf32>
    %190 = vector.shape_cast %189 : vector<1x1x32xf32> to vector<1x32xf32>
    %191 = vector.extract_strided_slice %18 {offsets = [1, 1, 0], sizes = [1, 1, 32], strides = [1, 1, 1]} : vector<2x9x32xf32> to vector<1x1x32xf32>
    %192 = vector.shape_cast %191 : vector<1x1x32xf32> to vector<1x32xf32>
    %193 = vector.extract_strided_slice %18 {offsets = [1, 2, 0], sizes = [1, 1, 32], strides = [1, 1, 1]} : vector<2x9x32xf32> to vector<1x1x32xf32>
    %194 = vector.shape_cast %193 : vector<1x1x32xf32> to vector<1x32xf32>
    %195 = vector.extract_strided_slice %18 {offsets = [1, 3, 0], sizes = [1, 1, 32], strides = [1, 1, 1]} : vector<2x9x32xf32> to vector<1x1x32xf32>
    %196 = vector.shape_cast %195 : vector<1x1x32xf32> to vector<1x32xf32>
    %197 = vector.extract_strided_slice %18 {offsets = [1, 4, 0], sizes = [1, 1, 32], strides = [1, 1, 1]} : vector<2x9x32xf32> to vector<1x1x32xf32>
    %198 = vector.shape_cast %197 : vector<1x1x32xf32> to vector<1x32xf32>
    %199 = vector.extract_strided_slice %18 {offsets = [1, 5, 0], sizes = [1, 1, 32], strides = [1, 1, 1]} : vector<2x9x32xf32> to vector<1x1x32xf32>
    %200 = vector.shape_cast %199 : vector<1x1x32xf32> to vector<1x32xf32>
    %201 = vector.extract_strided_slice %18 {offsets = [1, 6, 0], sizes = [1, 1, 32], strides = [1, 1, 1]} : vector<2x9x32xf32> to vector<1x1x32xf32>
    %202 = vector.shape_cast %201 : vector<1x1x32xf32> to vector<1x32xf32>
    %203 = vector.extract_strided_slice %18 {offsets = [1, 7, 0], sizes = [1, 1, 32], strides = [1, 1, 1]} : vector<2x9x32xf32> to vector<1x1x32xf32>
    %204 = vector.shape_cast %203 : vector<1x1x32xf32> to vector<1x32xf32>
    %205 = vector.extract_strided_slice %18 {offsets = [1, 8, 0], sizes = [1, 1, 32], strides = [1, 1, 1]} : vector<2x9x32xf32> to vector<1x1x32xf32>
    %206 = vector.shape_cast %205 : vector<1x1x32xf32> to vector<1x32xf32>
    %207 = arith.truncf %188 : vector<16x32xf32> to vector<16x32xbf16>
    %c1 = arith.constant 1 : index
    %c0_53 = arith.constant 0 : index
    %c0_54 = arith.constant 0 : index
    %208 = vector.load %arg4[%c1, %c0_53, %c0_54] : memref<2x32x96xbf16, #tpu.memory_space<vmem>>, vector<1x32x96xbf16>
    %209 = vector.shape_cast %208 : vector<1x32x96xbf16> to vector<32x96xbf16>
    %cst_55 = arith.constant dense<0.000000e+00> : vector<16x96xf32>
    %210 = tpu.matmul %207, %209, %cst_55 {dimension_numbers = #tpu.dot_dimension_numbers<[1], [0], [0], [1], [0, 0, 1, 1], [], []>} : vector<16x32xbf16>, vector<32x96xbf16>, vector<16x96xf32> -> vector<16x96xf32>
    %c1_56 = arith.constant 1 : index
    %c0_57 = arith.constant 0 : index
    %c0_58 = arith.constant 0 : index
    %211 = vector.load %arg5[%c1_56, %c0_57, %c0_58] : memref<2x1x96xf32, #tpu.memory_space<vmem>>, vector<1x1x96xf32>
    %212 = vector.shape_cast %211 : vector<1x1x96xf32> to vector<1x96xf32>
    %213 = vector.broadcast %212 : vector<1x96xf32> to vector<16x96xf32>
    %214 = arith.addf %210, %213 : vector<16x96xf32>
    %215 = vector.extract_strided_slice %214 {offsets = [0, 0], sizes = [16, 8], strides = [1, 1]} : vector<16x96xf32> to vector<16x8xf32>
    %216 = vector.shape_cast %215 : vector<16x8xf32> to vector<2x8x8xf32>
    %217 = vector.extract_strided_slice %214 {offsets = [0, 8], sizes = [16, 8], strides = [1, 1]} : vector<16x96xf32> to vector<16x8xf32>
    %218 = vector.shape_cast %217 : vector<16x8xf32> to vector<2x8x8xf32>
    %219 = vector.extract_strided_slice %214 {offsets = [0, 16], sizes = [16, 8], strides = [1, 1]} : vector<16x96xf32> to vector<16x8xf32>
    %220 = vector.shape_cast %219 : vector<16x8xf32> to vector<2x8x8xf32>
    %221 = vector.extract_strided_slice %214 {offsets = [0, 24], sizes = [16, 8], strides = [1, 1]} : vector<16x96xf32> to vector<16x8xf32>
    %222 = vector.shape_cast %221 : vector<16x8xf32> to vector<2x8x8xf32>
    %223 = tpu.concatenate %216, %218, %220, %222 in 0 : vector<2x8x8xf32>, vector<2x8x8xf32>, vector<2x8x8xf32>, vector<2x8x8xf32> -> vector<8x8x8xf32>
    %224 = vector.extract_strided_slice %214 {offsets = [0, 32], sizes = [16, 8], strides = [1, 1]} : vector<16x96xf32> to vector<16x8xf32>
    %225 = vector.shape_cast %224 : vector<16x8xf32> to vector<2x8x8xf32>
    %226 = vector.extract_strided_slice %214 {offsets = [0, 40], sizes = [16, 8], strides = [1, 1]} : vector<16x96xf32> to vector<16x8xf32>
    %227 = vector.shape_cast %226 : vector<16x8xf32> to vector<2x8x8xf32>
    %228 = vector.extract_strided_slice %214 {offsets = [0, 48], sizes = [16, 8], strides = [1, 1]} : vector<16x96xf32> to vector<16x8xf32>
    %229 = vector.shape_cast %228 : vector<16x8xf32> to vector<2x8x8xf32>
    %230 = vector.extract_strided_slice %214 {offsets = [0, 56], sizes = [16, 8], strides = [1, 1]} : vector<16x96xf32> to vector<16x8xf32>
    %231 = vector.shape_cast %230 : vector<16x8xf32> to vector<2x8x8xf32>
    %232 = tpu.concatenate %225, %227, %229, %231 in 0 : vector<2x8x8xf32>, vector<2x8x8xf32>, vector<2x8x8xf32>, vector<2x8x8xf32> -> vector<8x8x8xf32>
    %233 = vector.extract_strided_slice %214 {offsets = [0, 64], sizes = [16, 8], strides = [1, 1]} : vector<16x96xf32> to vector<16x8xf32>
    %234 = vector.shape_cast %233 : vector<16x8xf32> to vector<2x8x8xf32>
    %235 = vector.extract_strided_slice %214 {offsets = [0, 72], sizes = [16, 8], strides = [1, 1]} : vector<16x96xf32> to vector<16x8xf32>
    %236 = vector.shape_cast %235 : vector<16x8xf32> to vector<2x8x8xf32>
    %237 = vector.extract_strided_slice %214 {offsets = [0, 80], sizes = [16, 8], strides = [1, 1]} : vector<16x96xf32> to vector<16x8xf32>
    %238 = vector.shape_cast %237 : vector<16x8xf32> to vector<2x8x8xf32>
    %239 = vector.extract_strided_slice %214 {offsets = [0, 88], sizes = [16, 8], strides = [1, 1]} : vector<16x96xf32> to vector<16x8xf32>
    %240 = vector.shape_cast %239 : vector<16x8xf32> to vector<2x8x8xf32>
    %241 = tpu.concatenate %234, %236, %238, %240 in 0 : vector<2x8x8xf32>, vector<2x8x8xf32>, vector<2x8x8xf32>, vector<2x8x8xf32> -> vector<8x8x8xf32>
    "tpu.trace_start"() <{level = 10 : i32, message = "bqd,bkd->bqk"}> : () -> ()
    %cst_59 = arith.constant dense<0.000000e+00> : vector<8x8x8xf32>
    %242 = tpu.matmul %223, %232, %cst_59 {dimension_numbers = #tpu.dot_dimension_numbers<[2], [2], [1], [1], [0, 0, 0, 1, 1, 1], [0], [0]>} : vector<8x8x8xf32>, vector<8x8x8xf32>, vector<8x8x8xf32> -> vector<8x8x8xf32>
    %cst_60 = arith.constant -1.000000e+30 : f32
    "tpu.trace_stop"() : () -> ()
    %243 = vector.shape_cast %17 : vector<8x8xi1> to vector<1x8x8xi1>
    %244 = vector.broadcast %243 : vector<1x8x8xi1> to vector<8x8x8xi1>
    %245 = vector.broadcast %cst_60 : f32 to vector<8x8x8xf32>
    %246 = arith.select %244, %245, %242 : vector<8x8x8xi1>, vector<8x8x8xf32>
    %cst_61 = arith.constant dense<0xFF800000> : vector<8x8xf32>
    %247 = vector.multi_reduction <maximumf>, %246, %cst_61 [2] : vector<8x8x8xf32> to vector<8x8xf32>
    %248 = vector.shape_cast %247 : vector<8x8xf32> to vector<8x8x1xf32>
    %249 = vector.broadcast %248 : vector<8x8x1xf32> to vector<8x8x8xf32>
    %250 = arith.subf %246, %249 : vector<8x8x8xf32>
    %251 = math.exp %250 : vector<8x8x8xf32>
    %cst_62 = arith.constant dense<0.000000e+00> : vector<8x8xf32>
    %252 = vector.multi_reduction <add>, %251, %cst_62 [2] : vector<8x8x8xf32> to vector<8x8xf32>
    %253 = vector.shape_cast %252 : vector<8x8xf32> to vector<8x8x1xf32>
    %254 = tpu.reciprocal %253 {approx = true} : vector<8x8x1xf32> -> vector<8x8x1xf32>
    %255 = vector.broadcast %254 : vector<8x8x1xf32> to vector<8x8x8xf32>
    %256 = arith.mulf %251, %255 : vector<8x8x8xf32>
    "tpu.trace_start"() <{level = 10 : i32, message = "bqk,bkd->bqd"}> : () -> ()
    %cst_63 = arith.constant dense<0.000000e+00> : vector<8x8x8xf32>
    %257 = tpu.matmul %256, %241, %cst_63 {dimension_numbers = #tpu.dot_dimension_numbers<[2], [1], [1], [2], [0, 0, 0, 1, 1, 2], [0], [0]>} : vector<8x8x8xf32>, vector<8x8x8xf32>, vector<8x8x8xf32> -> vector<8x8x8xf32>
    "tpu.trace_stop"() : () -> ()
    %258 = vector.extract_strided_slice %257 {offsets = [0, 0, 0], sizes = [2, 8, 8], strides = [1, 1, 1]} : vector<8x8x8xf32> to vector<2x8x8xf32>
    %259 = vector.shape_cast %258 : vector<2x8x8xf32> to vector<16x8xf32>
    %260 = vector.extract_strided_slice %257 {offsets = [2, 0, 0], sizes = [2, 8, 8], strides = [1, 1, 1]} : vector<8x8x8xf32> to vector<2x8x8xf32>
    %261 = vector.shape_cast %260 : vector<2x8x8xf32> to vector<16x8xf32>
    %262 = vector.extract_strided_slice %257 {offsets = [4, 0, 0], sizes = [2, 8, 8], strides = [1, 1, 1]} : vector<8x8x8xf32> to vector<2x8x8xf32>
    %263 = vector.shape_cast %262 : vector<2x8x8xf32> to vector<16x8xf32>
    %264 = vector.extract_strided_slice %257 {offsets = [6, 0, 0], sizes = [2, 8, 8], strides = [1, 1, 1]} : vector<8x8x8xf32> to vector<2x8x8xf32>
    %265 = vector.shape_cast %264 : vector<2x8x8xf32> to vector<16x8xf32>
    %266 = tpu.concatenate %259, %261, %263, %265 in 1 : vector<16x8xf32>, vector<16x8xf32>, vector<16x8xf32>, vector<16x8xf32> -> vector<16x32xf32>
    %267 = arith.truncf %266 : vector<16x32xf32> to vector<16x32xbf16>
    %c1_64 = arith.constant 1 : index
    %c0_65 = arith.constant 0 : index
    %c0_66 = arith.constant 0 : index
    %268 = vector.load %arg6[%c1_64, %c0_65, %c0_66] : memref<2x32x32xbf16, #tpu.memory_space<vmem>>, vector<1x32x32xbf16>
    %269 = vector.shape_cast %268 : vector<1x32x32xbf16> to vector<32x32xbf16>
    %cst_67 = arith.constant dense<0.000000e+00> : vector<16x32xf32>
    %270 = tpu.matmul %267, %269, %cst_67 {dimension_numbers = #tpu.dot_dimension_numbers<[1], [0], [0], [1], [0, 0, 1, 1], [], []>} : vector<16x32xbf16>, vector<32x32xbf16>, vector<16x32xf32> -> vector<16x32xf32>
    %271 = vector.broadcast %190 : vector<1x32xf32> to vector<16x32xf32>
    %272 = arith.addf %270, %271 : vector<16x32xf32>
    %273 = arith.addf %188, %272 : vector<16x32xf32>
    %cst_68 = arith.constant dense<0.000000e+00> : vector<16xf32>
    %274 = vector.multi_reduction <add>, %273, %cst_68 [1] : vector<16x32xf32> to vector<16xf32>
    %275 = vector.shape_cast %274 : vector<16xf32> to vector<16x1xf32>
    %cst_69 = arith.constant 3.200000e+01 : f32
    %276 = vector.broadcast %cst_69 : f32 to vector<16x1xf32>
    %277 = arith.divf %275, %276 : vector<16x1xf32>
    %278 = vector.broadcast %277 : vector<16x1xf32> to vector<16x32xf32>
    %279 = arith.subf %273, %278 : vector<16x32xf32>
    %280 = arith.mulf %279, %279 : vector<16x32xf32>
    %cst_70 = arith.constant dense<0.000000e+00> : vector<16xf32>
    %281 = vector.multi_reduction <add>, %280, %cst_70 [1] : vector<16x32xf32> to vector<16xf32>
    %282 = vector.shape_cast %281 : vector<16xf32> to vector<16x1xf32>
    %cst_71 = arith.constant 3.200000e+01 : f32
    %283 = vector.broadcast %cst_71 : f32 to vector<16x1xf32>
    %284 = arith.divf %282, %283 : vector<16x1xf32>
    %285 = vector.broadcast %277 : vector<16x1xf32> to vector<16x32xf32>
    %286 = arith.subf %273, %285 : vector<16x32xf32>
    %cst_72 = arith.constant 9.99999974E-6 : f32
    %287 = vector.broadcast %cst_72 : f32 to vector<16x1xf32>
    %288 = arith.addf %284, %287 : vector<16x1xf32>
    %289 = math.rsqrt %288 : vector<16x1xf32>
    %290 = vector.broadcast %289 : vector<16x1xf32> to vector<16x32xf32>
    %291 = arith.mulf %286, %290 : vector<16x32xf32>
    %292 = vector.broadcast %194 : vector<1x32xf32> to vector<16x32xf32>
    %293 = arith.mulf %291, %292 : vector<16x32xf32>
    %294 = vector.broadcast %196 : vector<1x32xf32> to vector<16x32xf32>
    %295 = arith.addf %293, %294 : vector<16x32xf32>
    %296 = vector.broadcast %192 : vector<1x32xf32> to vector<16x32xf32>
    %297 = arith.addf %295, %296 : vector<16x32xf32>
    %cst_73 = arith.constant dense<0.000000e+00> : vector<16xf32>
    %298 = vector.multi_reduction <add>, %297, %cst_73 [1] : vector<16x32xf32> to vector<16xf32>
    %299 = vector.shape_cast %298 : vector<16xf32> to vector<16x1xf32>
    %cst_74 = arith.constant 3.200000e+01 : f32
    %300 = vector.broadcast %cst_74 : f32 to vector<16x1xf32>
    %301 = arith.divf %299, %300 : vector<16x1xf32>
    %302 = vector.broadcast %301 : vector<16x1xf32> to vector<16x32xf32>
    %303 = arith.subf %297, %302 : vector<16x32xf32>
    %304 = arith.mulf %303, %303 : vector<16x32xf32>
    %cst_75 = arith.constant dense<0.000000e+00> : vector<16xf32>
    %305 = vector.multi_reduction <add>, %304, %cst_75 [1] : vector<16x32xf32> to vector<16xf32>
    %306 = vector.shape_cast %305 : vector<16xf32> to vector<16x1xf32>
    %cst_76 = arith.constant 3.200000e+01 : f32
    %307 = vector.broadcast %cst_76 : f32 to vector<16x1xf32>
    %308 = arith.divf %306, %307 : vector<16x1xf32>
    %309 = vector.broadcast %301 : vector<16x1xf32> to vector<16x32xf32>
    %310 = arith.subf %297, %309 : vector<16x32xf32>
    %cst_77 = arith.constant 9.99999974E-6 : f32
    %311 = vector.broadcast %cst_77 : f32 to vector<16x1xf32>
    %312 = arith.addf %308, %311 : vector<16x1xf32>
    %313 = math.rsqrt %312 : vector<16x1xf32>
    %314 = vector.broadcast %313 : vector<16x1xf32> to vector<16x32xf32>
    %315 = arith.mulf %310, %314 : vector<16x32xf32>
    %316 = vector.broadcast %198 : vector<1x32xf32> to vector<16x32xf32>
    %317 = arith.mulf %315, %316 : vector<16x32xf32>
    %318 = vector.broadcast %200 : vector<1x32xf32> to vector<16x32xf32>
    %319 = arith.addf %317, %318 : vector<16x32xf32>
    %320 = arith.truncf %319 : vector<16x32xf32> to vector<16x32xbf16>
    %c1_78 = arith.constant 1 : index
    %c0_79 = arith.constant 0 : index
    %c0_80 = arith.constant 0 : index
    %321 = vector.load %arg7[%c1_78, %c0_79, %c0_80] : memref<2x32x64xbf16, #tpu.memory_space<vmem>>, vector<1x32x64xbf16>
    %322 = vector.shape_cast %321 : vector<1x32x64xbf16> to vector<32x64xbf16>
    %cst_81 = arith.constant dense<0.000000e+00> : vector<16x64xf32>
    %323 = tpu.matmul %320, %322, %cst_81 {dimension_numbers = #tpu.dot_dimension_numbers<[1], [0], [0], [1], [0, 0, 1, 1], [], []>} : vector<16x32xbf16>, vector<32x64xbf16>, vector<16x64xf32> -> vector<16x64xf32>
    %c1_82 = arith.constant 1 : index
    %c0_83 = arith.constant 0 : index
    %c0_84 = arith.constant 0 : index
    %324 = vector.load %arg10[%c1_82, %c0_83, %c0_84] : memref<2x1x64xf32, #tpu.memory_space<vmem>>, vector<1x1x64xf32>
    %325 = vector.shape_cast %324 : vector<1x1x64xf32> to vector<1x64xf32>
    %326 = vector.broadcast %325 : vector<1x64xf32> to vector<16x64xf32>
    %327 = arith.addf %323, %326 : vector<16x64xf32>
    %cst_85 = arith.constant 0.000000e+00 : f32
    %328 = vector.broadcast %cst_85 : f32 to vector<16x64xf32>
    %329 = arith.maximumf %327, %328 : vector<16x64xf32>
    %330 = arith.truncf %329 : vector<16x64xf32> to vector<16x64xbf16>
    %c1_86 = arith.constant 1 : index
    %c0_87 = arith.constant 0 : index
    %c0_88 = arith.constant 0 : index
    %331 = vector.load %arg8[%c1_86, %c0_87, %c0_88] : memref<2x64x32xbf16, #tpu.memory_space<vmem>>, vector<1x64x32xbf16>
    %332 = vector.shape_cast %331 : vector<1x64x32xbf16> to vector<64x32xbf16>
    %cst_89 = arith.constant dense<0.000000e+00> : vector<16x32xf32>
    %333 = tpu.matmul %330, %332, %cst_89 {dimension_numbers = #tpu.dot_dimension_numbers<[1], [0], [0], [1], [0, 0, 1, 1], [], []>} : vector<16x64xbf16>, vector<64x32xbf16>, vector<16x32xf32> -> vector<16x32xf32>
    %334 = vector.broadcast %206 : vector<1x32xf32> to vector<16x32xf32>
    %335 = arith.addf %333, %334 : vector<16x32xf32>
    %336 = arith.addf %319, %335 : vector<16x32xf32>
    %cst_90 = arith.constant dense<0.000000e+00> : vector<16xf32>
    %337 = vector.multi_reduction <add>, %336, %cst_90 [1] : vector<16x32xf32> to vector<16xf32>
    %338 = vector.shape_cast %337 : vector<16xf32> to vector<16x1xf32>
    %cst_91 = arith.constant 3.200000e+01 : f32
    %339 = vector.broadcast %cst_91 : f32 to vector<16x1xf32>
    %340 = arith.divf %338, %339 : vector<16x1xf32>
    %341 = vector.broadcast %340 : vector<16x1xf32> to vector<16x32xf32>
    %342 = arith.subf %336, %341 : vector<16x32xf32>
    %343 = arith.mulf %342, %342 : vector<16x32xf32>
    %cst_92 = arith.constant dense<0.000000e+00> : vector<16xf32>
    %344 = vector.multi_reduction <add>, %343, %cst_92 [1] : vector<16x32xf32> to vector<16xf32>
    %345 = vector.shape_cast %344 : vector<16xf32> to vector<16x1xf32>
    %cst_93 = arith.constant 3.200000e+01 : f32
    %346 = vector.broadcast %cst_93 : f32 to vector<16x1xf32>
    %347 = arith.divf %345, %346 : vector<16x1xf32>
    %348 = vector.broadcast %340 : vector<16x1xf32> to vector<16x32xf32>
    %349 = arith.subf %336, %348 : vector<16x32xf32>
    %cst_94 = arith.constant 9.99999974E-6 : f32
    %350 = vector.broadcast %cst_94 : f32 to vector<16x1xf32>
    %351 = arith.addf %347, %350 : vector<16x1xf32>
    %352 = math.rsqrt %351 : vector<16x1xf32>
    %353 = vector.broadcast %352 : vector<16x1xf32> to vector<16x32xf32>
    %354 = arith.mulf %349, %353 : vector<16x32xf32>
    %355 = vector.broadcast %202 : vector<1x32xf32> to vector<16x32xf32>
    %356 = arith.mulf %354, %355 : vector<16x32xf32>
    %357 = vector.broadcast %204 : vector<1x32xf32> to vector<16x32xf32>
    %358 = arith.addf %356, %357 : vector<16x32xf32>
    %359 = arith.truncf %358 : vector<16x32xf32> to vector<16x32xbf16>
    %c0_95 = arith.constant 0 : index
    %c0_96 = arith.constant 0 : index
    %360 = vector.load %arg11[%c0_95, %c0_96] : memref<32x128xbf16, #tpu.memory_space<vmem>>, vector<32x128xbf16>
    %cst_97 = arith.constant dense<0.000000e+00> : vector<16x128xf32>
    %361 = tpu.matmul %359, %360, %cst_97 {dimension_numbers = #tpu.dot_dimension_numbers<[1], [0], [0], [1], [0, 0, 1, 1], [], []>} : vector<16x32xbf16>, vector<32x128xbf16>, vector<16x128xf32> -> vector<16x128xf32>
    %c0_98 = arith.constant 0 : index
    %c0_99 = arith.constant 0 : index
    %362 = vector.load %arg12[%c0_98, %c0_99] : memref<1x128xf32, #tpu.memory_space<vmem>>, vector<1x128xf32>
    %363 = vector.broadcast %362 : vector<1x128xf32> to vector<16x128xf32>
    %364 = arith.addf %361, %363 : vector<16x128xf32>
    %c0_100 = arith.constant 0 : index
    %c0_101 = arith.constant 0 : index
    %365 = vector.load %arg13[%c0_100, %c0_101] : memref<16x128xf32, #tpu.memory_space<vmem>>, vector<16x128xf32>
    tpu.vector_store %arg13[%c0_100, %c0_101], %364 {strides = array<i32>} : memref<16x128xf32, #tpu.memory_space<vmem>>, vector<16x128xf32>,
    return
  }
  func.func @transform_0(%arg0: i32) -> (i32, i32) {
    %c0_i32 = arith.constant 0 : i32
    %c0_i32_0 = arith.constant 0 : i32
    %c0_i32_1 = arith.constant 0 : i32
    return %c0_i32, %c0_i32_0 : i32, i32
  }
  func.func @transform_1(%arg0: i32) -> (i32, i32) {
    %c0_i32 = arith.constant 0 : i32
    %c0_i32_0 = arith.constant 0 : i32
    %c0_i32_1 = arith.constant 0 : i32
    return %c0_i32, %c0_i32_0 : i32, i32
  }
  func.func @transform_2(%arg0: i32) -> (i32, i32, i32) {
    %c0_i32 = arith.constant 0 : i32
    %c0_i32_0 = arith.constant 0 : i32
    %c0_i32_1 = arith.constant 0 : i32
    %c0_i32_2 = arith.constant 0 : i32
    return %c0_i32, %c0_i32_0, %c0_i32_1 : i32, i32, i32
  }
  func.func @transform_3(%arg0: i32) -> (i32, i32, i32) {
    %c0_i32 = arith.constant 0 : i32
    %c0_i32_0 = arith.constant 0 : i32
    %c0_i32_1 = arith.constant 0 : i32
    %c0_i32_2 = arith.constant 0 : i32
    return %c0_i32, %c0_i32_0, %c0_i32_1 : i32, i32, i32
  }
  func.func @transform_4(%arg0: i32) -> (i32, i32, i32) {
    %c0_i32 = arith.constant 0 : i32
    %c0_i32_0 = arith.constant 0 : i32
    %c0_i32_1 = arith.constant 0 : i32
    %c0_i32_2 = arith.constant 0 : i32
    return %c0_i32, %c0_i32_0, %c0_i32_1 : i32, i32, i32
  }
  func.func @transform_5(%arg0: i32) -> (i32, i32, i32) {
    %c0_i32 = arith.constant 0 : i32
    %c0_i32_0 = arith.constant 0 : i32
    %c0_i32_1 = arith.constant 0 : i32
    %c0_i32_2 = arith.constant 0 : i32
    return %c0_i32, %c0_i32_0, %c0_i32_1 : i32, i32, i32
  }
  func.func @transform_6(%arg0: i32) -> (i32, i32, i32) {
    %c0_i32 = arith.constant 0 : i32
    %c0_i32_0 = arith.constant 0 : i32
    %c0_i32_1 = arith.constant 0 : i32
    %c0_i32_2 = arith.constant 0 : i32
    return %c0_i32, %c0_i32_0, %c0_i32_1 : i32, i32, i32
  }
  func.func @transform_7(%arg0: i32) -> (i32, i32, i32) {
    %c0_i32 = arith.constant 0 : i32
    %c0_i32_0 = arith.constant 0 : i32
    %c0_i32_1 = arith.constant 0 : i32
    %c0_i32_2 = arith.constant 0 : i32
    return %c0_i32, %c0_i32_0, %c0_i32_1 : i32, i32, i32
  }
  func.func @transform_8(%arg0: i32) -> (i32, i32, i32) {
    %c0_i32 = arith.constant 0 : i32
    %c0_i32_0 = arith.constant 0 : i32
    %c0_i32_1 = arith.constant 0 : i32
    %c0_i32_2 = arith.constant 0 : i32
    return %c0_i32, %c0_i32_0, %c0_i32_1 : i32, i32, i32
  }
  func.func @transform_9(%arg0: i32) -> (i32, i32, i32) {
    %c0_i32 = arith.constant 0 : i32
    %c0_i32_0 = arith.constant 0 : i32
    %c0_i32_1 = arith.constant 0 : i32
    %c0_i32_2 = arith.constant 0 : i32
    return %c0_i32, %c0_i32_0, %c0_i32_1 : i32, i32, i32
  }
  func.func @transform_10(%arg0: i32) -> (i32, i32) {
    %c0_i32 = arith.constant 0 : i32
    %c0_i32_0 = arith.constant 0 : i32
    %c0_i32_1 = arith.constant 0 : i32
    return %c0_i32, %c0_i32_0 : i32, i32
  }
  func.func @transform_11(%arg0: i32) -> (i32, i32) {
    %c0_i32 = arith.constant 0 : i32
    %c0_i32_0 = arith.constant 0 : i32
    %c0_i32_1 = arith.constant 0 : i32
    return %c0_i32, %c0_i32_0 : i32, i32
  }
  func.func @transform_12(%arg0: i32) -> (i32, i32) {
    %c0_i32 = arith.constant 0 : i32
    %c0_i32_0 = arith.constant 0 : i32
    %c0_i32_1 = arith.constant 0 : i32
    return %c0_i32, %c0_i32_0 : i32, i32
  }
}

</mosaic_0001>

<bundles_post_ra>
// kernel: tpu_custom_call.1
= control target key start
LH: loop header
LB: loop body
LE: loop exit
PB: predicated region body
PF: predicated region fallthrough
CT: control target
= control target key end

     0   :  { %v4458_v2 = vmov 0   ;;  %v4459_v11 = vmov 0.0   ;;  %s5236_s0 = inlined_call_operand.vmem [shape: s32[16,1], index: 0, kind: input, shape index: {}]   ;;  %s5237_s1 = inlined_call_operand.vmem [shape: f32[64,32], index: 1, kind: input, shape index: {}]   ;;  %s5238_s2 = inlined_call_operand.vmem [shape: f32[1,8,32], index: 2, kind: input, shape index: {}]   ;;  %s5239_s3 = inlined_call_operand.vmem [shape: bf16[2,32,96], index: 3, kind: input, shape index: {}]   ;;  %s5240_s4 = inlined_call_operand.vmem [shape: f32[2,1,96], index: 4, kind: input, shape index: {}]   ;;  %s5241_s5 = inlined_call_operand.vmem [shape: bf16[2,32,32], index: 5, kind: input, shape index: {}]   ;;  %s5242_s6 = inlined_call_operand.vmem [shape: bf16[2,32,64], index: 6, kind: input, shape index: {}]   ;;  %s5243_s7 = inlined_call_operand.vmem [shape: bf16[2,64,32], index: 7, kind: input, shape index: {}]   ;;  %s5244_s8 = inlined_call_operand.vmem [shape: f32[2,9,32], index: 8, kind: input, shape index: {}]   ;;  %s5245_s9 = inlined_call_operand.vmem [shape: f32[2,1,64], index: 9, kind: input, shape index: {}]   ;;  %s5246_s10 = inlined_call_operand.vmem [shape: bf16[32,128], index: 10, kind: input, shape index: {}]   ;;  %s5247_s11 = inlined_call_operand.vmem [shape: f32[1,128], index: 11, kind: input, shape index: {}]   ;;  %s5248_s12 = inlined_call_operand.hbm [shape: f32[16,128], index: 12, kind: output, shape index: {}]  }
   0x1   :  { %v43_v0 = vld [vmem:[%s5236_s0] sm:$0xff]  ;;  %4293 = vset.pattern.permute.xlu0 %v4458_v2  ;;  %v60_v3 = vld [vmem:[%s5237_s1 + $0x8] sm:$0xff]  ;;  %v61_v4 = vld [vmem:[%s5237_s1 + $0x10] sm:$0xff]  ;;  %4024 = vmatprep.subr.bf16.mxu1 %v4459_v11 }
   0x2   :  { %v59_v1 = vld [vmem:[%s5237_s1] sm:$0xff]  ;;  %v62_v5 = vld [vmem:[%s5237_s1 + $0x18] sm:$0xff]  ;;  %48 = vperm.xlu0 %4293, %v43_v0   ;;  %v44_v6 = vld [vmem:[%s5236_s0 + $0x8] sm:$0xff] }
   0x3   :  { %v4264_v7 = vpack.c.bf16 %v60_v3, %v59_v1  ;;  %v4268_v8 = vpack.c.bf16 %v62_v5, %v61_v4  ;;  %v63_v9 = vld [vmem:[%s5237_s1 + $0x20] sm:$0xff]  ;;  %v64_v10 = vld [vmem:[%s5237_s1 + $0x28] sm:$0xff]  ;;  %v65_v12 = vld [vmem:[%s5237_s1 + $0x30] sm:$0xff] }
   0x4   :  { %v66_v13 = vld [vmem:[%s5237_s1 + $0x38] sm:$0xff]  ;;  %v4272_v14 = vpack.c.bf16 %v64_v10, %v63_v9 }
   0x5   :  { %4265 = vmatprep.subr.bf16.mxu0 %v4264_v7  ;;  %v4276_v15 = vpack.c.bf16 %v66_v13, %v65_v12 }
   0x6   :  { %4267 = vmatpush3.bf16.msra.mxu0 %v4264_v7  ;;  %51 = vperm.xlu0 %4293, %v44_v6  }
   0x7   :  { %4269 = vmatprep.subr.bf16.mxu0 %v4268_v8 }
   0xa   :  { %4271 = vmatpush3.bf16.msra.mxu0 %v4268_v8 }
   0xb   :  { %4273 = vmatprep.subr.bf16.mxu0 %v4272_v14 }
   0xe   :  { %4275 = vmatpush3.bf16.msra.mxu0 %v4272_v14 }
   0xf   :  { %4277 = vmatprep.subr.bf16.mxu0 %v4276_v15 }
  0x12   :  { %4279 = vmatpush3.bf16.msra.mxu0 %v4276_v15 }
  0x13   :  { %4037 = vmatprep.subr.mxu0 %v4459_v11 }
  0x14   :  { %17 = vsyncpa [#allocation3], 0  ;;  %v45_v16 = vlaneseq  ;;  %vm67_vm0 = vcmask 523264   ;;  %v4324_v22 = vld [vmem:[%s5239_s3] sm:$0xff]   ;;  %v4325_v23 = vld [vmem:[%s5239_s3 + $0x8] sm:$0xff]   ;;  %vm4460_vm3 = vmmov 0  }
  0x15   :  { %4025 = vmatpush3.bf16.msra.mxu1 %v4324_v22  ;;  %4028 = vmatprep.mubr.msk.bf16.mxu1 %vm4460_vm3, %v4459_v11  ;;  %v151_v25 = vld [vmem:[%s5238_s2] sm:$0xff]  ;;  %vm185_vm4 = vcmask 261120   ;;  %s4461_s2 = smov 112   ;;  %s4462_s29 = smov 120   ;;  %vm246_vm5 = vcmask 64512   ;;  %vm1585_vm7 = vcmask 130048  }
  0x16   :  { %v4569_v17 = vand.u32 127, %v45_v16  ;;  %4026 = vmatprep.subr.bf16.mxu1 %v4459_v11  ;;  %v3792_v32 = vld [vmem:[%s5240_s4] ss:$0 sm:$0xff]  ;;  %s4463_s30 = smov 104   ;;  %s4464_s13 = smov 96   ;;  %v4697_v53 = vshrl.u32 %v45_v16, 7 }
  0x17   :  { %s4465_s14 = smov 64   ;;  %s4466_s19 = smov 8   ;;  %vm1588_vm8 = vcmask 195584  }
  0x18   :  { %vm4701_vm6 = vcmp.gt.s32.totalorder %v4569_v17, %v4697_v53  ;;  %s4467_s20 = smov 16   ;;  %s4468_s0 = smov 24  }
  0x19   :  { %4027 = vmatpush3.bf16.msra.mxu1 %v4325_v23 }
  0x1a   :  { %4032 = vmatprep.subr.mxu1 %v4459_v11 }
  0x81   :  { %v49_v18 = vpop.permute.xlu0 %48 }
  0x82   :  { %vm53_vm1 = vcmp.eq.s32.totalorder %v49_v18, %v4569_v17 }
  0x83   :  { %v3788_v19 = vsel %vm53_vm1, 1.0, %v4459_v11 }
  0x84   :  { %4021 = vmatprep.mubr.msk.f32.mxu0 %vm67_vm0, %v3788_v19 }
  0x85   :  { %v52_v20 = vpop.permute.xlu0 %51 }
  0x86   :  { %vm54_vm2 = vcmp.eq.s32.totalorder %v52_v20, %v4569_v17 }
  0x87   :  { %v3789_v21 = vsel %vm54_vm2, 1.0, %v4459_v11 }
  0x88   :  { %4022 = vmatmul.mubr.msk.f32.vlgmr.msra.gmra.mrb[0].mxu0 %vm67_vm0, %v3789_v21 }
  0x89   :  { %4039 = vmatprep.mubr.msk.f32.mxu0 %vm4460_vm3, %v4459_v11 }
 0x15b   :  { %v4023_v24 = vpop.f32.mrb[0].mxu0 }
 0x15c   :  { %v150_v26 = vmul.f32 5.656854, %v4023_v24  ;;  %v140_v27 = vpop.f32.mrb[1].mxu0 }
 0x15d   :  { %v149_v28 = vmul.f32 5.656854, %v140_v27 }
 0x15e   :  { %v4592_v29 = vadd.f32 %v151_v25, %v150_v26 }
 0x15f   :  { %v4594_v30 = vadd.f32 %v151_v25, %v149_v28 }
 0x161   :  { %v161_v31 = vpack.c.bf16 %v4592_v29, %v4594_v30 }
 0x163   :  { %4029 = vmatmul.mubr.msk.bf16.vlgmr.msra.gmra.mrb[0].mxu1 %vm185_vm4, %v161_v31 }
 0x164   :  { %4034 = vmatprep.mubr.msk.f32.mxu1 %vm4460_vm3, %v4459_v11 }
 0x236   :  { %v223_v33 = vpop.f32.mrb[0].mxu1 }
 0x237   :  { %v4604_v34 = vadd.f32 %v3792_v32, %v223_v33  ;;  %v4030_v35 = vpop.f32.mrb[1].mxu1 }
 0x238   :  { %v226_v36 = vpop.f32.mrb[2].mxu1 }
 0x239   :  { %236 = vrot.lane.b32.xlu0 %v4604_v34, %s4461_s2  ;;  %232 = vrot.lane.b32.xlu1 %v4604_v34, %s4462_s29  ;;  %v4031_v37 = vpop.f32.mrb[3].mxu1  ;;  %v4610_v38 = vadd.f32 %v3792_v32, %v226_v36 }
 0x23d   :  { %240 = vrot.lane.b32.xlu0 %v4604_v34, %s4463_s30  ;;  %234 = vrot.lane.b32.xlu1 %v4610_v38, %s4462_s29 }
 0x241   :  { %244 = vrot.lane.b32.xlu0 %v4604_v34, %s4464_s13  ;;  %238 = vrot.lane.b32.xlu1 %v4610_v38, %s4461_s2 }
 0x245   :  { %242 = vrot.lane.b32.xlu1 %v4610_v38, %s4463_s30 }
 0x249   :  { %321 = vrot.lane.b32.xlu1 %v4610_v38, %s4464_s13 }
 0x2ab   :  { %v4624_v39 = vpop.permute.xlu0 %236  ;;  %v4626_v40 = vpop.permute.xlu1 %232 }
 0x2ac   :  { %397 = vrot.lane.b32.xlu0 %v4626_v40, %s4464_s13 }
 0x2af   :  { %v4630_v41 = vpop.permute.xlu0 %240  ;;  %v4632_v42 = vpop.permute.xlu1 %234 }
 0x2b0   :  { %549 = vrot.lane.b32.xlu0 %v4624_v39, %s4464_s13  ;;  %473 = vrot.lane.b32.xlu1 %v4632_v42, %s4464_s13 }
 0x2b3   :  { %v245_v43 = vpop.permute.xlu0 %244  ;;  %v4638_v44 = vpop.permute.xlu1 %238 }
 0x2b4   :  { %4033 = vmatpush3.xpose.msk.msra.mxu1 %vm246_vm5, %v245_v43  ;;  %701 = vrot.lane.b32.xlu0 %v4630_v41, %s4464_s13 }
 0x2b5   :  { %625 = vrot.lane.b32.xlu1 %v4638_v44, %s4464_s13  ;;  %4042 = vmatprep.subr.mxu1 %v4459_v11 }
 0x2b7   :  { %4035 = vmatmul.mubr.msk.f32.vlgmr.msra.gmra.mrb[4].mxu1 %vm246_vm5, %v4604_v34  ;;  %v4648_v45 = vpop.permute.xlu1 %242 }
 0x2b8   :  { %4044 = vmatprep.mubr.msk.f32.mxu1 %vm4460_vm3, %v4459_v11 }
 0x2b9   :  { %777 = vrot.lane.b32.xlu1 %v4648_v45, %s4464_s13 }
 0x2bb   :  { %v322_v46 = vpop.permute.xlu1 %321 }
 0x2bc   :  { %4038 = vmatpush3.xpose.msk.msra.mxu0 %vm246_vm5, %v322_v46 }
 0x2bd   :  { %4047 = vmatprep.subr.mxu0 %v4459_v11 }
 0x2bf   :  { %4040 = vmatmul.mubr.msk.f32.vlgmr.msra.gmra.mrb[2].mxu0 %vm246_vm5, %v4610_v38 }
 0x2c0   :  { %4049 = vmatprep.mubr.msk.f32.mxu0 %vm4460_vm3, %v4459_v11 }
 0x31e   :  { %v398_v47 = vpop.permute.xlu0 %397 }
 0x31f   :  { %4043 = vmatpush3.xpose.msk.msra.mxu1 %vm246_vm5, %v398_v47 }
 0x320   :  { %4052 = vmatprep.subr.mxu1 %v4459_v11 }
 0x322   :  { %4045 = vmatmul.mubr.msk.f32.vlgmr.msra.gmra.mrb[6].mxu1 %vm246_vm5, %v4626_v40  ;;  %v550_v48 = vpop.permute.xlu0 %549  ;;  %v474_v49 = vpop.permute.xlu1 %473 }
 0x323   :  { %4048 = vmatpush3.xpose.msk.msra.mxu0 %vm246_vm5, %v474_v49  ;;  %4053 = vmatpush3.xpose.msk.msra.mxu1 %vm246_vm5, %v550_v48 }
 0x324   :  { %4054 = vmatprep.mubr.msk.f32.mxu1 %vm4460_vm3, %v4459_v11  ;;  %4062 = vmatprep.subr.mxu1 %v4459_v11 }
 0x325   :  { %4057 = vmatprep.subr.mxu0 %v4459_v11 }
 0x326   :  { %4055 = vmatmul.mubr.msk.f32.vlgmr.msra.gmra.mrb[8].mxu1 %vm246_vm5, %v4624_v39  ;;  %v702_v50 = vpop.permute.xlu0 %701  ;;  %4050 = vmatmul.mubr.msk.f32.vlgmr.msra.gmra.mrb[4].mxu0 %vm246_vm5, %v4632_v42 }
 0x327   :  { %v626_v51 = vpop.permute.xlu1 %625  ;;  %4063 = vmatpush3.xpose.msk.msra.mxu1 %vm246_vm5, %v702_v50  ;;  %4059 = vmatprep.mubr.msk.f32.mxu0 %vm4460_vm3, %v4459_v11 }
 0x328   :  { %4058 = vmatpush3.xpose.msk.msra.mxu0 %vm246_vm5, %v626_v51  ;;  %4064 = vmatprep.mubr.msk.f32.mxu1 %vm4460_vm3, %v4459_v11 }
 0x329   :  { %4067 = vmatprep.subr.mxu0 %v4459_v11  ;;  %4072 = vmatprep.subr.mxu1 %v4459_v11 }
 0x32a   :  { %4065 = vmatmul.mubr.msk.f32.vlgmr.msra.gmra.mrb[10].mxu1 %vm246_vm5, %v4630_v41 }
 0x32b   :  { %4060 = vmatmul.mubr.msk.f32.vlgmr.msra.gmra.mrb[6].mxu0 %vm246_vm5, %v4638_v44  ;;  %v778_v52 = vpop.permute.xlu1 %777  ;;  %4074 = vmatprep.mubr.msk.f32.mxu1 %vm4460_vm3, %v4459_v11 }
 0x32c   :  { %4068 = vmatpush3.xpose.msk.msra.mxu0 %vm246_vm5, %v778_v52  ;;  %4069 = vmatprep.mubr.msk.f32.mxu0 %vm4460_vm3, %v4459_v11 }
 0x32d   :  { %4077 = vmatprep.subr.mxu0 %v4459_v11 }
 0x32f   :  { %4070 = vmatmul.mubr.msk.f32.vlgmr.msra.gmra.mrb[8].mxu0 %vm246_vm5, %v4648_v45 }
 0x330   :  { %4079 = vmatprep.mubr.msk.f32.mxu0 %vm4460_vm3, %v4459_v11 }
 0x38a   :  { %v317_v55 = vpop.f32.mrb[4].mxu1 }
 0x38b   :  { %v855_v56 = vsel %vm4701_vm6, -1e+30, %v317_v55  ;;  %v4036_v57 = vpop.f32.mrb[5].mxu1 }
 0x38c   :  { %v863_v58 = vsel %vm246_vm5, %v855_v56, -inf }
 0x38d   :  { %864 = vmax.xlane.f32.xlu0 %v863_v58 }
 0x392   :  { %v393_v59 = vpop.f32.mrb[2].mxu0 }
 0x393   :  { %v856_v60 = vsel %vm4701_vm6, -1e+30, %v393_v59  ;;  %v4041_v61 = vpop.f32.mrb[3].mxu0 }
 0x394   :  { %v866_v62 = vsel %vm246_vm5, %v856_v60, -inf }
 0x395   :  { %867 = vmax.xlane.f32.xlu1 %v866_v62 }
 0x3f5   :  { %v469_v63 = vpop.f32.mrb[6].mxu1 }
 0x3f6   :  { %v857_v0 = vsel %vm4701_vm6, -1e+30, %v469_v63  ;;  %v4046_v1 = vpop.f32.mrb[7].mxu1 }
 0x3f7   :  { %v869_v2 = vsel %vm246_vm5, %v857_v0, -inf }
 0x3f8   :  { %870 = vmax.xlane.f32.xlu0 %v869_v2 }
 0x3f9   :  { %v545_v3 = vpop.f32.mrb[4].mxu0  ;;  %v621_v4 = vpop.f32.mrb[8].mxu1 }
 0x3fa   :  { %v858_v5 = vsel %vm4701_vm6, -1e+30, %v545_v3  ;;  %v859_v6 = vsel %vm4701_vm6, -1e+30, %v621_v4  ;;  %v4051_v7 = vpop.f32.mrb[5].mxu0  ;;  %v4056_v8 = vpop.f32.mrb[9].mxu1 }
 0x3fb   :  { %v872_v9 = vsel %vm246_vm5, %v858_v5, -inf  ;;  %v875_v10 = vsel %vm246_vm5, %v859_v6, -inf }
 0x3fc   :  { %873 = vmax.xlane.f32.xlu0 %v872_v9  ;;  %876 = vmax.xlane.f32.xlu1 %v875_v10 }
 0x3fd   :  { %v773_v12 = vpop.f32.mrb[10].mxu1 }
 0x3fe   :  { %v697_v13 = vpop.f32.mrb[6].mxu0  ;;  %v861_v14 = vsel %vm4701_vm6, -1e+30, %v773_v12  ;;  %v4066_v15 = vpop.f32.mrb[11].mxu1 }
 0x3ff   :  { %v860_v16 = vsel %vm4701_vm6, -1e+30, %v697_v13  ;;  %v4061_v17 = vpop.f32.mrb[7].mxu0  ;;  %v881_v18 = vsel %vm246_vm5, %v861_v14, -inf }
 0x400   :  { %v878_v19 = vsel %vm246_vm5, %v860_v16, -inf  ;;  %882 = vmax.xlane.f32.xlu1 %v881_v18 }
 0x401   :  { %879 = vmax.xlane.f32.xlu0 %v878_v19 }
 0x402   :  { %v849_v20 = vpop.f32.mrb[8].mxu0 }
 0x403   :  { %v862_v21 = vsel %vm4701_vm6, -1e+30, %v849_v20  ;;  %v4071_v22 = vpop.f32.mrb[9].mxu0 }
 0x404   :  { %v884_v23 = vsel %vm246_vm5, %v862_v21, -inf }
 0x405   :  { %885 = vmax.xlane.f32.xlu0 %v884_v23 }
 0x411   :  { %951 = vrot.lane.b32.xlu1 %v4604_v34, %s4465_s14 }
 0x415   :  { %1103 = vrot.lane.b32.xlu1 %v4626_v40, %s4465_s14 }
 0x419   :  { %1179 = vrot.lane.b32.xlu1 %v4632_v42, %s4465_s14 }
 0x41a   :  { %v865_v25 = vpop.xlane.xlu0 %864 }
 0x41b   :  { %1027 = vrot.lane.b32.xlu0 %v4610_v38, %s4465_s14  ;;  %v887_v27 = vsub.f32 %v855_v56, %v865_v25 }
 0x41d   :  { %1331 = vrot.lane.b32.xlu1 %v4638_v44, %s4465_s14  ;;  %v895_v31 = vmul.f32 1.442695, %v887_v27 }
 0x41f   :  { %1255 = vrot.lane.b32.xlu0 %v4624_v39, %s4465_s14 }
 0x422   :  { %v868_v24 = vpop.xlane.xlu1 %867 }
 0x423   :  { %v888_v26 = vsub.f32 %v856_v60, %v868_v24 }
 0x425   :  { %v897_v28 = vmul.f32 1.442695, %v888_v26 }
 0x427   :  { %4346 = vpow2.f32 %v897_v28 }
 0x428   :  { %4348 = vpow2.f32 %v895_v31 }
 0x431   :  { %v4741_v32 = vpop.eup %4346 }
 0x432   :  { %v4743_v33 = vpop.eup %4348  ;;  %v914_v34 = vsel %vm246_vm5, %v4741_v32, 0.0 }
 0x433   :  { %v911_v35 = vsel %vm246_vm5, %v4743_v33, 0.0 }
 0x43e   :  { %915 = vadd.xlane.f32.xlu0 %v914_v34 }
 0x441   :  { %912 = vadd.xlane.f32.xlu1 %v911_v35 }
 0x485   :  { %v871_v36 = vpop.xlane.xlu0 %870 }
 0x486   :  { %v889_v37 = vsub.f32 %v857_v0, %v871_v36 }
 0x488   :  { %v899_v38 = vmul.f32 1.442695, %v889_v37 }
 0x489   :  { %v874_v39 = vpop.xlane.xlu0 %873  ;;  %v877_v40 = vpop.xlane.xlu1 %876 }
 0x48a   :  { %4350 = vpow2.f32 %v899_v38  ;;  %v890_v42 = vsub.f32 %v858_v5, %v874_v39  ;;  %v891_v43 = vsub.f32 %v859_v6, %v877_v40 }
 0x48c   :  { %v901_v44 = vmul.f32 1.442695, %v890_v42  ;;  %v903_v46 = vmul.f32 1.442695, %v891_v43 }
 0x48d   :  { %v883_v47 = vpop.xlane.xlu1 %882 }
 0x48e   :  { %4352 = vpow2.f32 %v901_v44  ;;  %v880_v48 = vpop.xlane.xlu0 %879  ;;  %v893_v49 = vsub.f32 %v861_v14, %v883_v47 }
 0x48f   :  { %4354 = vpow2.f32 %v903_v46  ;;  %v892_v50 = vsub.f32 %v860_v16, %v880_v48  ;;  %v4326_v46 = vld [vmem:[%s5241_s5] sm:$0xff]  }
 0x490   :  { %v907_v51 = vmul.f32 1.442695, %v893_v49  ;;  %v4327_v49 = vld [vmem:[%s5241_s5 + $0x8] sm:$0xff]  }
 0x491   :  { %v905_v52 = vmul.f32 1.442695, %v892_v50  ;;  %v952_v55 = vpop.permute.xlu1 %951 }
 0x492   :  { %4356 = vpow2.f32 %v907_v51  ;;  %v886_v56 = vpop.xlane.xlu0 %885  ;;  %4073 = vmatpush3.msra.mxu1 %v952_v55 }
 0x493   :  { %4358 = vpow2.f32 %v905_v52  ;;  %v894_v57 = vsub.f32 %v862_v21, %v886_v56  ;;  %4082 = vmatprep.subr.mxu1 %v4459_v11 }
 0x494   :  { %v4351_v58 = vpop.eup %4350 }
 0x495   :  { %v909_v59 = vmul.f32 1.442695, %v894_v57  ;;  %v917_v60 = vsel %vm246_vm5, %v4351_v58, 0.0  ;;  %v1104_v8 = vpop.permute.xlu1 %1103 }
 0x496   :  { %v1028_v61 = vpop.permute.xlu0 %1027  ;;  %918 = vadd.xlane.f32.xlu1 %v917_v60 }
 0x497   :  { %4360 = vpow2.f32 %v909_v59  ;;  %4078 = vmatpush3.msra.mxu0 %v1028_v61 }
 0x498   :  { %v4353_v62 = vpop.eup %4352  ;;  %4087 = vmatprep.subr.mxu0 %v4459_v11 }
 0x499   :  { %v4355_v63 = vpop.eup %4354  ;;  %v920_v0 = vsel %vm246_vm5, %v4353_v62, 0.0  ;;  %v1180_v9 = vpop.permute.xlu1 %1179 }
 0x49a   :  { %921 = vadd.xlane.f32.xlu0 %v920_v0  ;;  %v923_v1 = vsel %vm246_vm5, %v4355_v63, 0.0  ;;  %v1256_v10 = vpop.permute.xlu0 %1255 }
 0x49b   :  { %924 = vadd.xlane.f32.xlu1 %v923_v1 }
 0x49c   :  { %v4754_v2 = vpop.eup %4356 }
 0x49d   :  { %v4359_v3 = vpop.eup %4358  ;;  %v929_v4 = vsel %vm246_vm5, %v4754_v2, 0.0  ;;  %v1332_v12 = vpop.permute.xlu1 %1331 }
 0x49e   :  { %v926_v5 = vsel %vm246_vm5, %v4359_v3, 0.0 }
 0x49f   :  { %927 = vadd.xlane.f32.xlu0 %v926_v5  ;;  %930 = vadd.xlane.f32.xlu1 %v929_v4 }
 0x4a1   :  { %v4759_v6 = vpop.eup %4360 }
 0x4a2   :  { %v932_v7 = vsel %vm246_vm5, %v4759_v6, 0.0 }
 0x4a3   :  { %933 = vadd.xlane.f32.xlu0 %v932_v7 }
 0x4b0   :  { %1483 = vrot.lane.b32.xlu1 %v4648_v45, %s4465_s14 }
 0x4b9   :  { %1407 = vrot.lane.b32.xlu0 %v4630_v41, %s4465_s14 }
 0x4cb   :  { %v916_v13 = vpop.xlane.xlu0 %915 }
 0x4cc   :  { %4362 = vrcp.f32 %v916_v13 }
 0x4ce   :  { %v913_v14 = vpop.xlane.xlu1 %912 }
 0x4cf   :  { %4364 = vrcp.f32 %v913_v14 }
 0x4d6   :  { %v4363_v15 = vpop.eup %4362 }
 0x4d7   :  { %v944_v16 = vmul.f32 %v4363_v15, %v4741_v32 }
 0x4d9   :  { %v4365_v17 = vpop.eup %4364  ;;  %4080 = vmatmul.mubr.msk.f32.vlgmr.msra.gmra.mrb[10].mxu0 %vm246_vm5, %v944_v16 }
 0x4da   :  { %v943_v18 = vmul.f32 %v4365_v17, %v4743_v33  ;;  %4088 = vmatpush3.msra.mxu0 %v1180_v9  ;;  %4089 = vmatprep.mubr.msk.f32.mxu0 %vm4460_vm3, %v4459_v11  ;;  %v1598_v17 = vsub.s32 0, %v4697_v53 }
 0x4db   :  { %4097 = vmatprep.subr.mxu0 %v4459_v11 }
 0x4dc   :  { %4075 = vmatmul.mubr.msk.f32.vlgmr.msra.gmra.mrb[12].mxu1 %vm246_vm5, %v943_v18  ;;  %v4825_v18 = vld [vmem:[%s5244_s8] sm:$0xff] }
 0x4dd   :  { %4083 = vmatpush3.msra.mxu1 %v1104_v8  ;;  %4084 = vmatprep.mubr.msk.f32.mxu1 %vm4460_vm3, %v4459_v11 }
 0x4de   :  { %4092 = vmatprep.subr.mxu1 %v4459_v11 }
 0x523   :  { %v919_v41 = vpop.xlane.xlu1 %918 }
 0x524   :  { %4366 = vrcp.f32 %v919_v41  ;;  %v1599_v41 = vrot.slane %v4825_v18, %v1598_v17 }
 0x527   :  { %v922_v45 = vpop.xlane.xlu0 %921 }
 0x528   :  { %4368 = vrcp.f32 %v922_v45  ;;  %v925_v19 = vpop.xlane.xlu1 %924 }
 0x529   :  { %4370 = vrcp.f32 %v925_v19 }
 0x52c   :  { %v928_v20 = vpop.xlane.xlu0 %927  ;;  %v931_v21 = vpop.xlane.xlu1 %930 }
 0x52d   :  { %4372 = vrcp.f32 %v928_v20 }
 0x52e   :  { %v4367_v22 = vpop.eup %4366  ;;  %4374 = vrcp.f32 %v931_v21 }
 0x52f   :  { %v945_v23 = vmul.f32 %v4367_v22, %v4351_v58 }
 0x530   :  { %v934_v24 = vpop.xlane.xlu0 %933  ;;  %v1484_v36 = vpop.permute.xlu1 %1483 }
 0x531   :  { %4376 = vrcp.f32 %v934_v24  ;;  %4085 = vmatmul.mubr.msk.f32.vlgmr.msra.gmra.mrb[14].mxu1 %vm246_vm5, %v945_v23 }
 0x532   :  { %v4369_v25 = vpop.eup %4368  ;;  %4093 = vmatpush3.msra.mxu1 %v1256_v10  ;;  %4094 = vmatprep.mubr.msk.f32.mxu1 %vm4460_vm3, %v4459_v11 }
 0x533   :  { %v4371_v26 = vpop.eup %4370  ;;  %v946_v27 = vmul.f32 %v4369_v25, %v4353_v62  ;;  %4102 = vmatprep.subr.mxu1 %v4459_v11 }
 0x534   :  { %v947_v28 = vmul.f32 %v4371_v26, %v4355_v63  ;;  %v1408_v31 = vpop.permute.xlu0 %1407 }
 0x535   :  { %4090 = vmatmul.mubr.msk.f32.vlgmr.msra.gmra.mrb[12].mxu0 %vm246_vm5, %v946_v27 }
 0x536   :  { %4095 = vmatmul.mubr.msk.f32.vlgmr.msra.gmra.mrb[16].mxu1 %vm246_vm5, %v947_v28  ;;  %4098 = vmatpush3.msra.mxu0 %v1332_v12 }
 0x537   :  { %v4373_v32 = vpop.eup %4372  ;;  %4103 = vmatpush3.msra.mxu1 %v1408_v31  ;;  %4099 = vmatprep.mubr.msk.f32.mxu0 %vm4460_vm3, %v4459_v11 }
 0x538   :  { %v4375_v33 = vpop.eup %4374  ;;  %v948_v34 = vmul.f32 %v4373_v32, %v4359_v3  ;;  %4104 = vmatprep.mubr.msk.f32.mxu1 %vm4460_vm3, %v4459_v11  ;;  %4107 = vmatprep.subr.mxu0 %v4459_v11 }
 0x539   :  { %v949_v35 = vmul.f32 %v4375_v33, %v4754_v2  ;;  %4112 = vmatprep.subr.bf16.mxu1 %v4459_v11 }
 0x53a   :  { %4100 = vmatmul.mubr.msk.f32.vlgmr.msra.gmra.mrb[14].mxu0 %vm246_vm5, %v948_v34 }
 0x53b   :  { %v4377_v37 = vpop.eup %4376  ;;  %4105 = vmatmul.mubr.msk.f32.vlgmr.msra.gmra.mrb[18].mxu1 %vm246_vm5, %v949_v35  ;;  %4108 = vmatpush3.msra.mxu0 %v1484_v36 }
 0x53c   :  { %v950_v38 = vmul.f32 %v4377_v37, %v4759_v6  ;;  %4109 = vmatprep.mubr.msk.f32.mxu0 %vm4460_vm3, %v4459_v11  ;;  %4116 = vmatprep.mubr.msk.bf16.mxu1 %vm4460_vm3, %v4459_v11 }
 0x53d   :  { %4120 = vmatprep.subr.bf16.mxu0 %v4459_v11  ;;  %4113 = vmatpush3.bf16.msra.mxu1 %v4326_v46  ;;  %v1687_v46 = vsub.s32 2, %v4697_v53 }
 0x53e   :  { %4110 = vmatmul.mubr.msk.f32.vlgmr.msra.gmra.mrb[16].mxu0 %vm246_vm5, %v950_v38  ;;  %4114 = vmatprep.subr.bf16.mxu1 %v4459_v11 }
 0x53f   :  { %4124 = vmatprep.mubr.msk.bf16.mxu0 %vm4460_vm3, %v4459_v11 }
 0x541   :  { %4115 = vmatpush3.bf16.msra.mxu1 %v4327_v49  ;;  %v1699_v49 = vsub.s32 1, %v4697_v53 }
 0x542   :  { %4128 = vmatprep.subr.bf16.mxu1 %v4459_v11 }
 0x5ac   :  { %v1099_v39 = vpop.f32.mrb[10].mxu0 }
 0x5ad   :  { %v4081_v40 = vpop.f32.mrb[11].mxu0 }
 0x5af   :  { %v1023_v42 = vpop.f32.mrb[12].mxu1 }
 0x5b0   :  { %v4076_v43 = vpop.f32.mrb[13].mxu1 }
 0x604   :  { %v1175_v44 = vpop.f32.mrb[14].mxu1 }
 0x605   :  { %v4086_v47 = vpop.f32.mrb[15].mxu1 }
 0x606   :  { %v1693_v47 = vsub.s32 3, %v4697_v53 }
 0x608   :  { %v1251_v48 = vpop.f32.mrb[12].mxu0 }
 0x609   :  { %v4294_v50 = vpack.i.bf16 %v1251_v48, %v1175_v44  ;;  %v1327_v51 = vpop.f32.mrb[16].mxu1  ;;  %v4091_v52 = vpop.f32.mrb[13].mxu0  ;;  %v1688_v48 = vrot.slane %v4825_v18, %v1687_v46 }
 0x60a   :  { %v4096_v55 = vpop.f32.mrb[17].mxu1  ;;  %v1694_v52 = vrot.slane %v4825_v18, %v1693_v47 }
 0x60b   :  { %4295 = vrot.lane.b32.xlu0 %v4294_v50, %s4466_s19 }
 0x60d   :  { %v1403_v56 = vpop.f32.mrb[14].mxu0 }
 0x60e   :  { %v4299_v57 = vpack.i.bf16 %v1403_v56, %v1327_v51  ;;  %v1479_v58 = vpop.f32.mrb[18].mxu1  ;;  %v4101_v59 = vpop.f32.mrb[15].mxu0 }
 0x60f   :  { %v4106_v60 = vpop.f32.mrb[19].mxu1 }
 0x610   :  { %4300 = vrot.lane.b32.xlu1 %v4299_v57, %s4467_s20  ;;  %v1700_v57 = vrot.slane %v4825_v18, %v1699_v49 }
 0x611   :  { %v1555_v61 = vpop.f32.mrb[16].mxu0 }
 0x612   :  { %v4304_v62 = vpack.i.bf16 %v1555_v61, %v1479_v58  ;;  %v4111_v63 = vpop.f32.mrb[17].mxu0 }
 0x614   :  { %4305 = vrot.lane.b32.xlu0 %v4304_v62, %s4468_s0 }
 0x67d   :  { %v4296_v0 = vpop.permute.xlu0 %4295 }
 0x67e   :  { %v4298_v2 = vunpack.i.h.bf16 %v4296_v0  ;;  %v4297_v3 = vunpack.i.l.bf16 %v4296_v0 }
 0x680   :  { %v1584_v7 = vsel %vm246_vm5, %v1099_v39, %v4298_v2  ;;  %v1583_v8 = vsel %vm246_vm5, %v1023_v42, %v4297_v3 }
 0x682   :  { %v4301_v1 = vpop.permute.xlu1 %4300 }
 0x683   :  { %v4303_v4 = vunpack.i.h.bf16 %v4301_v1  ;;  %v4302_v5 = vunpack.i.l.bf16 %v4301_v1 }
 0x685   :  { %v1587_v12 = vsel %vm1585_vm7, %v1584_v7, %v4303_v4  ;;  %v1586_v13 = vsel %vm1585_vm7, %v1583_v8, %v4302_v5 }
 0x686   :  { %v4306_v6 = vpop.permute.xlu0 %4305 }
 0x687   :  { %v4308_v9 = vunpack.i.h.bf16 %v4306_v6  ;;  %v4307_v10 = vunpack.i.l.bf16 %v4306_v6 }
 0x689   :  { %v1590_v14 = vsel %vm1588_vm8, %v1587_v12, %v4308_v9  ;;  %v1589_v15 = vsel %vm1588_vm8, %v1586_v13, %v4307_v10  ;;  %v4328_v13 = vld [vmem:[%s5242_s6] sm:$0xff]  }
 0x68a   :  { %v1591_v16 = vpack.c.bf16 %v1590_v14, %v1589_v15  ;;  %4121 = vmatpush3.bf16.msra.mxu0 %v4328_v13  ;;  %v4329_v14 = vld [vmem:[%s5242_s6 + $0x8] sm:$0xff]   ;;  %v4330_v15 = vld [vmem:[%s5243_s7] sm:$0xff]   ;;  %v4334_v13 = vld [vmem:[%s5239_s3 + $0x10] sm:$0xff]  }
 0x68b   :  { %4122 = vmatprep.subr.bf16.mxu0 %v4459_v11 }
 0x68c   :  { %4117 = vmatmul.mubr.msk.bf16.vlgmr.msra.gmra.mrb[20].mxu1 %vm185_vm4, %v1591_v16  ;;  %v4331_v16 = vld [vmem:[%s5243_s7 + $0x8] sm:$0xff]  }
 0x68d   :  { %4136 = vmatprep.mubr.msk.bf16.mxu1 %vm4460_vm3, %v4459_v11  ;;  %4129 = vmatpush3.bf16.msra.mxu1 %v4330_v15 }
 0x68e   :  { %4123 = vmatpush3.bf16.msra.mxu0 %v4329_v14  ;;  %4130 = vmatprep.subr.bf16.mxu1 %v4459_v11  ;;  %v4335_v14 = vld [vmem:[%s5239_s3 + $0x18] sm:$0xff]  }
 0x68f   :  { %4140 = vmatprep.subr.bf16.mxu0 %v4459_v11 }
 0x691   :  { %4131 = vmatpush3.bf16.msra.mxu1 %v4331_v16 }
 0x692   :  { %4132 = vmatprep.subr.bf16.mxu1 %v4459_v11 }
 0x75f   :  { %v1649_v45 = vpop.f32.mrb[20].mxu1 }
 0x760   :  { %v1650_v19 = vadd.f32 %v1649_v45, %v1599_v41  ;;  %v4118_v20 = vpop.f32.mrb[21].mxu1 }
 0x761   :  { %v1652_v21 = vpop.f32.mrb[22].mxu1 }
 0x762   :  { %v1653_v22 = vadd.f32 %v1652_v21, %v1599_v41  ;;  %v4119_v23 = vpop.f32.mrb[23].mxu1  ;;  %v1656_v24 = vadd.f32 %v1650_v19, %v4594_v30 }
 0x763   :  { %v1731_v23 = vsub.s32 4, %v4697_v53 }
 0x764   :  { %v1658_v25 = vsel %vm185_vm4, %v1656_v24, 0.0  ;;  %v1657_v26 = vadd.f32 %v1653_v22, %v4592_v29 }
 0x765   :  { %1659 = vadd.xlane.f32.xlu1 %v1658_v25  ;;  %v1737_v25 = vsub.s32 5, %v4697_v53 }
 0x766   :  { %v1661_v27 = vsel %vm185_vm4, %v1657_v26, 0.0 }
 0x767   :  { %1662 = vadd.xlane.f32.xlu0 %v1661_v27 }
 0x7f2   :  { %v1660_v28 = vpop.xlane.xlu1 %1659 }
 0x7f3   :  { %v1665_v31 = vmul.f32 0.03125, %v1660_v28 }
 0x7f4   :  { %v1663_v32 = vpop.xlane.xlu0 %1662 }
 0x7f5   :  { %v1667_v33 = vsub.f32 %v1656_v24, %v1665_v31  ;;  %v1666_v34 = vmul.f32 0.03125, %v1663_v32  ;;  %v1732_v24 = vrot.slane %v4825_v18, %v1731_v23 }
 0x7f7   :  { %v1668_v35 = vsub.f32 %v1657_v26, %v1666_v34  ;;  %v1669_v36 = vmul.f32 %v1667_v33, %v1667_v33 }
 0x7f9   :  { %v1671_v37 = vsel %vm185_vm4, %v1669_v36, 0.0  ;;  %v1670_v38 = vmul.f32 %v1668_v35, %v1668_v35 }
 0x7fa   :  { %1672 = vadd.xlane.f32.xlu0 %v1671_v37 }
 0x7fb   :  { %v1674_v30 = vsel %vm185_vm4, %v1670_v38, 0.0  ;;  %v4332_v38 = vld [vmem:[%s5243_s7 + $0x10] sm:$0xff]  }
 0x7fc   :  { %1675 = vadd.xlane.f32.xlu1 %v1674_v30  ;;  %4133 = vmatpush3.bf16.msra.mxu1 %v4332_v38  ;;  %v4333_v30 = vld [vmem:[%s5243_s7 + $0x18] sm:$0xff]   ;;  %v3838_v38 = vld [vmem:[%s5240_s4 + $0x1] ss:$0 sm:$0xff]  ;;  %s4469_s4 = smov [#allocation2]  }
 0x7fd   :  { %4134 = vmatprep.subr.bf16.mxu1 %v4459_v11 }
 0x800   :  { %4135 = vmatpush3.bf16.msra.mxu1 %v4333_v30 }
 0x801   :  { %4158 = vmatprep.subr.mxu1 %v4459_v11 }
 0x887   :  { %v1673_v39 = vpop.xlane.xlu0 %1672 }
 0x888   :  { %v1677_v29 = vmul.f32 0.03125, %v1673_v39  ;;  %v3823_v39 = vld [vmem:[%s5245_s9] ss:$0 sm:$0xff] }
 0x889   :  { %v1676_v40 = vpop.xlane.xlu1 %1675 }
 0x88a   :  { %v1679_v42 = vadd.f32 1e-05, %v1677_v29  ;;  %v1678_v43 = vmul.f32 0.03125, %v1676_v40 }
 0x88c   :  { %4378 = vrsqrt.f32 %v1679_v42  ;;  %v1680_v44 = vadd.f32 1e-05, %v1678_v43 }
 0x88e   :  { %4380 = vrsqrt.f32 %v1680_v44 }
 0x896   :  { %v4379_v50 = vpop.eup %4378 }
 0x897   :  { %v1683_v51 = vmul.f32 %v4379_v50, %v1667_v33  ;;  %v1738_v33 = vrot.slane %v4825_v18, %v1737_v25 }
 0x898   :  { %v4381_v55 = vpop.eup %4380 }
 0x899   :  { %v1689_v56 = vmul.f32 %v1688_v48, %v1683_v51  ;;  %v1684_v58 = vmul.f32 %v4381_v55, %v1668_v35  ;;  %v3827_v55 = vld [vmem:[%s5244_s8 + $0x8] ss:$0 sm:$0xff] }
 0x89b   :  { %v1695_v59 = vadd.f32 %v1694_v52, %v1689_v56  ;;  %v1690_v60 = vmul.f32 %v1688_v48, %v1684_v58 }
 0x89d   :  { %v1701_v61 = vadd.f32 %v1700_v57, %v1695_v59  ;;  %v1696_v62 = vadd.f32 %v1694_v52, %v1690_v60 }
 0x89f   :  { %v1703_v63 = vsel %vm185_vm4, %v1701_v61, 0.0  ;;  %v1702_v0 = vadd.f32 %v1700_v57, %v1696_v62 }
 0x8a0   :  { %1704 = vadd.xlane.f32.xlu0 %v1703_v63 }
 0x8a1   :  { %v1706_v1 = vsel %vm185_vm4, %v1702_v0, 0.0 }
 0x8a2   :  { %1707 = vadd.xlane.f32.xlu1 %v1706_v1 }
 0x92d   :  { %v1705_v2 = vpop.xlane.xlu0 %1704 }
 0x92e   :  { %v1709_v3 = vmul.f32 0.03125, %v1705_v2 }
 0x92f   :  { %v1708_v4 = vpop.xlane.xlu1 %1707 }
 0x930   :  { %v1711_v5 = vsub.f32 %v1701_v61, %v1709_v3  ;;  %v1710_v6 = vmul.f32 0.03125, %v1708_v4 }
 0x932   :  { %v1712_v7 = vsub.f32 %v1702_v0, %v1710_v6  ;;  %v1713_v8 = vmul.f32 %v1711_v5, %v1711_v5 }
 0x934   :  { %v1715_v9 = vsel %vm185_vm4, %v1713_v8, 0.0  ;;  %v1714_v10 = vmul.f32 %v1712_v7, %v1712_v7 }
 0x935   :  { %1716 = vadd.xlane.f32.xlu0 %v1715_v9 }
 0x936   :  { %v1718_v12 = vsel %vm185_vm4, %v1714_v10, 0.0 }
 0x937   :  { %1719 = vadd.xlane.f32.xlu1 %v1718_v12 }
 0x9c2   :  { %v1717_v41 = vpop.xlane.xlu0 %1716 }
 0x9c3   :  { %v1721_v45 = vmul.f32 0.03125, %v1717_v41 }
 0x9c4   :  { %v1720_v19 = vpop.xlane.xlu1 %1719 }
 0x9c5   :  { %v1723_v20 = vadd.f32 1e-05, %v1721_v45  ;;  %v1722_v21 = vmul.f32 0.03125, %v1720_v19 }
 0x9c7   :  { %4382 = vrsqrt.f32 %v1723_v20  ;;  %v1724_v22 = vadd.f32 1e-05, %v1722_v21  ;;  %v1922_v21 = vsub.s32 6, %v4697_v53 }
 0x9c9   :  { %4384 = vrsqrt.f32 %v1724_v22  ;;  %v1923_v22 = vrot.slane %v4825_v18, %v1922_v21 }
 0x9d1   :  { %v4383_v26 = vpop.eup %4382 }
 0x9d2   :  { %v1727_v27 = vmul.f32 %v4383_v26, %v1711_v5 }
 0x9d3   :  { %v4385_v28 = vpop.eup %4384 }
 0x9d4   :  { %v1733_v31 = vmul.f32 %v1732_v24, %v1727_v27  ;;  %v1728_v32 = vmul.f32 %v4385_v28, %v1712_v7 }
 0x9d6   :  { %v1734_v34 = vmul.f32 %v1732_v24, %v1728_v32  ;;  %v1739_v35 = vadd.f32 %v1738_v33, %v1733_v31  ;;  %v1928_v24 = vsub.s32 7, %v4697_v53 }
 0x9d8   :  { %v1740_v36 = vadd.f32 %v1738_v33, %v1734_v34  ;;  %v1929_v33 = vrot.slane %v4825_v18, %v1928_v24 }
 0x9da   :  { %v1741_v37 = vpack.c.bf16 %v1740_v36, %v1739_v35 }
 0x9dc   :  { %4125 = vmatmul.mubr.msk.bf16.vlgmr.msra.gmra.mrb[20].mxu0 %vm185_vm4, %v1741_v37 }
 0x9dd   :  { %4144 = vmatprep.mubr.msk.bf16.mxu0 %vm4460_vm3, %v4459_v11  ;;  %4141 = vmatpush3.bf16.msra.mxu0 %v4334_v13 }
 0x9de   :  { %4142 = vmatprep.subr.bf16.mxu0 %v4459_v11 }
 0x9e1   :  { %4143 = vmatpush3.bf16.msra.mxu0 %v4335_v14 }
 0x9e2   :  { %4148 = vmatprep.subr.mxu0 %v4459_v11 }
 0xaaf   :  { %v1802_v29 = vpop.f32.mrb[20].mxu0 }
 0xab0   :  { %v1803_v40 = vadd.f32 %v3823_v39, %v1802_v29  ;;  %v4126_v42 = vpop.f32.mrb[21].mxu0 }
 0xab1   :  { %v1805_v43 = vpop.f32.mrb[22].mxu0 }
 0xab2   :  { %v1806_v44 = vadd.f32 %v3823_v39, %v1805_v43  ;;  %v4127_v48 = vpop.f32.mrb[23].mxu0  ;;  %v1809_v50 = vmax.f32 %v1803_v40, 0.0 }
 0xab4   :  { %v1810_v51 = vmax.f32 %v1806_v44, 0.0 }
 0xab6   :  { %v1811_v52 = vpack.c.bf16 %v1810_v51, %v1809_v50 }
 0xab8   :  { %4137 = vmatmul.mubr.msk.bf16.vlgmr.msra.gmra.mrb[24].mxu1 %vm67_vm0, %v1811_v52 }
 0xab9   :  { %4160 = vmatprep.mubr.msk.f32.mxu1 %vm4460_vm3, %v4459_v11 }
 0xb8b   :  { %v1885_v56 = vpop.f32.mrb[24].mxu1 }
 0xb8c   :  { %v1886_v57 = vadd.f32 %v3827_v55, %v1885_v56  ;;  %v4138_v58 = vpop.f32.mrb[25].mxu1 }
 0xb8d   :  { %v1888_v59 = vpop.f32.mrb[26].mxu1 }
 0xb8e   :  { %v1889_v60 = vadd.f32 %v3827_v55, %v1888_v59  ;;  %v4139_v61 = vpop.f32.mrb[27].mxu1  ;;  %v1892_v62 = vadd.f32 %v1886_v57, %v1739_v35 }
 0xb90   :  { %v1894_v63 = vsel %vm185_vm4, %v1892_v62, 0.0  ;;  %v1893_v0 = vadd.f32 %v1889_v60, %v1740_v36 }
 0xb91   :  { %1895 = vadd.xlane.f32.xlu0 %v1894_v63 }
 0xb92   :  { %v1897_v1 = vsel %vm185_vm4, %v1893_v0, 0.0 }
 0xb93   :  { %1898 = vadd.xlane.f32.xlu1 %v1897_v1 }
 0xc1e   :  { %v1896_v2 = vpop.xlane.xlu0 %1895 }
 0xc1f   :  { %v1900_v3 = vmul.f32 0.03125, %v1896_v2 }
 0xc20   :  { %v1899_v4 = vpop.xlane.xlu1 %1898 }
 0xc21   :  { %v1902_v5 = vsub.f32 %v1892_v62, %v1900_v3  ;;  %v1901_v6 = vmul.f32 0.03125, %v1899_v4 }
 0xc23   :  { %v1903_v7 = vsub.f32 %v1893_v0, %v1901_v6  ;;  %v1904_v8 = vmul.f32 %v1902_v5, %v1902_v5 }
 0xc25   :  { %v1906_v9 = vsel %vm185_vm4, %v1904_v8, 0.0  ;;  %v1905_v10 = vmul.f32 %v1903_v7, %v1903_v7 }
 0xc26   :  { %1907 = vadd.xlane.f32.xlu0 %v1906_v9 }
 0xc27   :  { %v1909_v12 = vsel %vm185_vm4, %v1905_v10, 0.0 }
 0xc28   :  { %1910 = vadd.xlane.f32.xlu1 %v1909_v12 }
 0xcb3   :  { %v1908_v15 = vpop.xlane.xlu0 %1907 }
 0xcb4   :  { %v1912_v16 = vmul.f32 0.03125, %v1908_v15 }
 0xcb5   :  { %v1911_v41 = vpop.xlane.xlu1 %1910 }
 0xcb6   :  { %v1914_v45 = vadd.f32 1e-05, %v1912_v16  ;;  %v1913_v19 = vmul.f32 0.03125, %v1911_v41 }
 0xcb8   :  { %4386 = vrsqrt.f32 %v1914_v45  ;;  %v1915_v20 = vadd.f32 1e-05, %v1913_v19 }
 0xcba   :  { %4388 = vrsqrt.f32 %v1915_v20 }
 0xcc2   :  { %v4387_v26 = vpop.eup %4386 }
 0xcc3   :  { %v1918_v27 = vmul.f32 %v4387_v26, %v1902_v5 }
 0xcc4   :  { %v4389_v28 = vpop.eup %4388 }
 0xcc5   :  { %v1924_v31 = vmul.f32 %v1923_v22, %v1918_v27  ;;  %v1919_v32 = vmul.f32 %v4389_v28, %v1903_v7 }
 0xcc7   :  { %v1925_v34 = vmul.f32 %v1923_v22, %v1919_v32  ;;  %v4916_v35 = vadd.f32 %v1929_v33, %v1924_v31 }
 0xcc9   :  { %v4918_v36 = vadd.f32 %v1929_v33, %v1925_v34 }
 0xccb   :  { %v1932_v37 = vpack.c.bf16 %v4918_v36, %v4916_v35 }
 0xccd   :  { %4145 = vmatmul.mubr.msk.bf16.vlgmr.msra.gmra.mrb[24].mxu0 %vm185_vm4, %v1932_v37 }
 0xcce   :  { %4150 = vmatprep.mubr.msk.f32.mxu0 %vm4460_vm3, %v4459_v11 }
 0xda0   :  { %v1995_v30 = vpop.f32.mrb[24].mxu0 }
 0xda1   :  { %v4928_v39 = vadd.f32 %v3838_v38, %v1995_v30  ;;  %v4146_v18 = vpop.f32.mrb[25].mxu0 }
 0xda2   :  { %v1998_v29 = vpop.f32.mrb[26].mxu0 }
 0xda3   :  { %v4930_v40 = vadd.f32 %v3838_v38, %v1998_v29  ;;  %2004 = vrot.lane.b32.xlu0 %v4928_v39, %s4462_s29  ;;  %v4147_v42 = vpop.f32.mrb[27].mxu0 }
 0xda5   :  { %2006 = vrot.lane.b32.xlu1 %v4930_v40, %s4462_s29 }
 0xda7   :  { %2010 = vrot.lane.b32.xlu0 %v4930_v40, %s4461_s2 }
 0xda9   :  { %2008 = vrot.lane.b32.xlu1 %v4928_v39, %s4461_s2  ;;  %s3777_s2 = sshll.u32 %s4469_s4, 4  ;;  %s3778_s2 = int_to_ptr.vmem [resolvable:$true] %s3777_s2 }
 0xdaa   :  { %s4434_s29 = scalar_lea.vmem %s3778_s2, 256  ;;  %p4439_p1 = scmp.lt.s32.totalorder %s3778_s2, %s3778_s2 }
 0xdab   :  { %2014 = vrot.lane.b32.xlu0 %v4930_v40, %s4463_s30  ;;  %p4435_p0 = scmp.ne.s32.totalorder %s3778_s2, %s4434_s29  ;;  %p4440_p2 = scmp.lt.s32.totalorder %s4434_s29, %s4434_s29 }
 0xdad   :  { %2012 = vrot.lane.b32.xlu1 %v4928_v39, %s4463_s30  ;;  %p4441_p3 = por %p4440_p2, %p4439_p1 }
 0xdaf   :  { %2092 = vrot.lane.b32.xlu0 %v4930_v40, %s4464_s13  ;;  %p4442_p4 = pnand %p4441_p3, %p4435_p0 }
 0xdb1   :  { %2016 = vrot.lane.b32.xlu1 %v4928_v39, %s4464_s13 }
 0xe15   :  { %v4948_v43 = vpop.permute.xlu0 %2004 }
 0xe16   :  { %2168 = vrot.lane.b32.xlu1 %v4948_v43, %s4464_s13 }
 0xe17   :  { %v4952_v44 = vpop.permute.xlu1 %2006 }
 0xe18   :  { %2244 = vrot.lane.b32.xlu0 %v4952_v44, %s4464_s13 }
 0xe19   :  { %v4956_v48 = vpop.permute.xlu0 %2010 }
 0xe1b   :  { %v4958_v50 = vpop.permute.xlu1 %2008 }
 0xe1c   :  { %2396 = vrot.lane.b32.xlu0 %v4956_v48, %s4464_s13  ;;  %2320 = vrot.lane.b32.xlu1 %v4958_v50, %s4464_s13 }
 0xe1d   :  { %v4964_v51 = vpop.permute.xlu0 %2014 }
 0xe1f   :  { %v4966_v52 = vpop.permute.xlu1 %2012 }
 0xe20   :  { %2548 = vrot.lane.b32.xlu0 %v4964_v51, %s4464_s13  ;;  %2472 = vrot.lane.b32.xlu1 %v4966_v52, %s4464_s13 }
 0xe21   :  { %v2093_v56 = vpop.permute.xlu0 %2092 }
 0xe23   :  { %v2017_v55 = vpop.permute.xlu1 %2016 }
 0xe24   :  { %4149 = vmatpush3.xpose.msk.msra.mxu0 %vm246_vm5, %v2017_v55 }
 0xe25   :  { %4153 = vmatprep.subr.mxu0 %v4459_v11 }
 0xe27   :  { %4151 = vmatmul.mubr.msk.f32.vlgmr.msra.gmra.mrb[18].mxu0 %vm246_vm5, %v4928_v39 }
 0xe28   :  { %4154 = vmatpush3.xpose.msk.msra.mxu0 %vm246_vm5, %v2093_v56  ;;  %4155 = vmatprep.mubr.msk.f32.mxu0 %vm4460_vm3, %v4459_v11 }
 0xe29   :  { %4163 = vmatprep.subr.mxu0 %v4459_v11 }
 0xe2b   :  { %4156 = vmatmul.mubr.msk.f32.vlgmr.msra.gmra.mrb[28].mxu0 %vm246_vm5, %v4930_v40 }
 0xe2c   :  { %4165 = vmatprep.mubr.msk.f32.mxu0 %vm4460_vm3, %v4459_v11 }
 0xe88   :  { %v2169_v57 = vpop.permute.xlu1 %2168 }
 0xe89   :  { %4159 = vmatpush3.xpose.msk.msra.mxu1 %vm246_vm5, %v2169_v57 }
 0xe8a   :  { %v2245_v58 = vpop.permute.xlu0 %2244  ;;  %4168 = vmatprep.subr.mxu1 %v4459_v11 }
 0xe8b   :  { %4164 = vmatpush3.xpose.msk.msra.mxu0 %vm246_vm5, %v2245_v58 }
 0xe8c   :  { %4161 = vmatmul.mubr.msk.f32.vlgmr.msra.gmra.mrb[28].mxu1 %vm246_vm5, %v4948_v43  ;;  %4173 = vmatprep.subr.mxu0 %v4459_v11 }
 0xe8d   :  { %4170 = vmatprep.mubr.msk.f32.mxu1 %vm4460_vm3, %v4459_v11 }
 0xe8e   :  { %v2397_v59 = vpop.permute.xlu0 %2396  ;;  %4166 = vmatmul.mubr.msk.f32.vlgmr.msra.gmra.mrb[30].mxu0 %vm246_vm5, %v4952_v44  ;;  %v2321_v60 = vpop.permute.xlu1 %2320 }
 0xe8f   :  { %4169 = vmatpush3.xpose.msk.msra.mxu1 %vm246_vm5, %v2321_v60  ;;  %4174 = vmatpush3.xpose.msk.msra.mxu0 %vm246_vm5, %v2397_v59 }
 0xe90   :  { %4175 = vmatprep.mubr.msk.f32.mxu0 %vm4460_vm3, %v4459_v11  ;;  %4178 = vmatprep.subr.mxu1 %v4459_v11 }
 0xe91   :  { %4183 = vmatprep.subr.mxu0 %v4459_v11 }
 0xe92   :  { %v2549_v61 = vpop.permute.xlu0 %2548  ;;  %4171 = vmatmul.mubr.msk.f32.vlgmr.msra.gmra.mrb[30].mxu1 %vm246_vm5, %v4958_v50  ;;  %4176 = vmatmul.mubr.msk.f32.vlgmr.msra.gmra.mrb[32].mxu0 %vm246_vm5, %v4956_v48  ;;  %v2473_v62 = vpop.permute.xlu1 %2472 }
 0xe93   :  { %4179 = vmatpush3.xpose.msk.msra.mxu1 %vm246_vm5, %v2473_v62  ;;  %4184 = vmatpush3.xpose.msk.msra.mxu0 %vm246_vm5, %v2549_v61 }
 0xe94   :  { %4180 = vmatprep.mubr.msk.f32.mxu1 %vm4460_vm3, %v4459_v11  ;;  %4185 = vmatprep.mubr.msk.f32.mxu0 %vm4460_vm3, %v4459_v11 }
 0xe95   :  { %4188 = vmatprep.subr.mxu1 %v4459_v11  ;;  %4193 = vmatprep.subr.mxu0 %v4459_v11 }
 0xe96   :  { %4181 = vmatmul.mubr.msk.f32.vlgmr.msra.gmra.mrb[32].mxu1 %vm246_vm5, %v4966_v52  ;;  %4186 = vmatmul.mubr.msk.f32.vlgmr.msra.gmra.mrb[34].mxu0 %vm246_vm5, %v4964_v51 }
 0xe97   :  { %4190 = vmatprep.mubr.msk.f32.mxu1 %vm4460_vm3, %v4459_v11  ;;  %4195 = vmatprep.mubr.msk.f32.mxu0 %vm4460_vm3, %v4459_v11 }
 0xefa   :  { %v2088_v63 = vpop.f32.mrb[18].mxu0 }
 0xefb   :  { %v2624_v0 = vsel %vm4701_vm6, -1e+30, %v2088_v63  ;;  %v4152_v1 = vpop.f32.mrb[19].mxu0 }
 0xefc   :  { %v2632_v2 = vsel %vm246_vm5, %v2624_v0, -inf }
 0xefd   :  { %2633 = vmax.xlane.f32.xlu1 %v2632_v2 }
 0xefe   :  { %v2164_v3 = vpop.f32.mrb[28].mxu0 }
 0xeff   :  { %v2625_v4 = vsel %vm4701_vm6, -1e+30, %v2164_v3  ;;  %v4157_v5 = vpop.f32.mrb[29].mxu0 }
 0xf00   :  { %v2635_v6 = vsel %vm246_vm5, %v2625_v4, -inf }
 0xf01   :  { %2636 = vmax.xlane.f32.xlu0 %v2635_v6 }
 0xf5f   :  { %v2240_v7 = vpop.f32.mrb[28].mxu1 }
 0xf60   :  { %v2626_v8 = vsel %vm4701_vm6, -1e+30, %v2240_v7  ;;  %v4162_v9 = vpop.f32.mrb[29].mxu1 }
 0xf61   :  { %v2316_v10 = vpop.f32.mrb[30].mxu0  ;;  %v2638_v12 = vsel %vm246_vm5, %v2626_v8, -inf }
 0xf62   :  { %v2627_v13 = vsel %vm4701_vm6, -1e+30, %v2316_v10  ;;  %v4167_v14 = vpop.f32.mrb[31].mxu0  ;;  %2639 = vmax.xlane.f32.xlu0 %v2638_v12 }
 0xf63   :  { %v2641_v15 = vsel %vm246_vm5, %v2627_v13, -inf }
 0xf64   :  { %2642 = vmax.xlane.f32.xlu1 %v2641_v15 }
 0xf65   :  { %v2392_v16 = vpop.f32.mrb[30].mxu1  ;;  %v2468_v41 = vpop.f32.mrb[32].mxu0 }
 0xf66   :  { %v2628_v45 = vsel %vm4701_vm6, -1e+30, %v2392_v16  ;;  %v2629_v19 = vsel %vm4701_vm6, -1e+30, %v2468_v41  ;;  %v4172_v20 = vpop.f32.mrb[31].mxu1  ;;  %v4177_v22 = vpop.f32.mrb[33].mxu0 }
 0xf67   :  { %v2647_v26 = vsel %vm246_vm5, %v2629_v19, -inf  ;;  %v2644_v27 = vsel %vm246_vm5, %v2628_v45, -inf }
 0xf68   :  { %2648 = vmax.xlane.f32.xlu1 %v2647_v26  ;;  %2645 = vmax.xlane.f32.xlu0 %v2644_v27 }
 0xf69   :  { %v2544_v28 = vpop.f32.mrb[32].mxu1  ;;  %v2620_v31 = vpop.f32.mrb[34].mxu0 }
 0xf6a   :  { %v2630_v32 = vsel %vm4701_vm6, -1e+30, %v2544_v28  ;;  %v2631_v33 = vsel %vm4701_vm6, -1e+30, %v2620_v31  ;;  %v4182_v34 = vpop.f32.mrb[33].mxu1  ;;  %v4187_v37 = vpop.f32.mrb[35].mxu0 }
 0xf6b   :  { %v2653_v38 = vsel %vm246_vm5, %v2631_v33, -inf  ;;  %v2650_v30 = vsel %vm246_vm5, %v2630_v32, -inf }
 0xf6c   :  { %2654 = vmax.xlane.f32.xlu1 %v2653_v38  ;;  %2651 = vmax.xlane.f32.xlu0 %v2650_v30 }
 0xf7d   :  { %2796 = vrot.lane.b32.xlu1 %v4930_v40, %s4465_s14 }
 0xf81   :  { %2872 = vrot.lane.b32.xlu1 %v4948_v43, %s4465_s14 }
 0xf82   :  { %2720 = vrot.lane.b32.xlu0 %v4928_v39, %s4465_s14 }
 0xf85   :  { %3024 = vrot.lane.b32.xlu1 %v4958_v50, %s4465_s14 }
 0xf86   :  { %2948 = vrot.lane.b32.xlu0 %v4952_v44, %s4465_s14 }
 0xf8a   :  { %3100 = vrot.lane.b32.xlu0 %v4956_v48, %s4465_s14  ;;  %v2634_v54 = vpop.xlane.xlu1 %2633 }
 0xf8b   :  { %v2656_v29 = vsub.f32 %v2624_v0, %v2634_v54 }
 0xf8d   :  { %v2664_v40 = vmul.f32 1.442695, %v2656_v29 }
 0xf8e   :  { %v2637_v18 = vpop.xlane.xlu0 %2636 }
 0xf8f   :  { %v2657_v42 = vsub.f32 %v2625_v4, %v2637_v18  ;;  %4390 = vpow2.f32 %v2664_v40 }
 0xf91   :  { %v2666_v55 = vmul.f32 1.442695, %v2657_v42 }
 0xf93   :  { %4392 = vpow2.f32 %v2666_v55 }
 0xf99   :  { %v5056_v43 = vpop.eup %4390 }
 0xf9a   :  { %v2680_v44 = vsel %vm246_vm5, %v5056_v43, 0.0 }
 0xf9d   :  { %v5058_v39 = vpop.eup %4392 }
 0xf9e   :  { %v2683_v50 = vsel %vm246_vm5, %v5058_v39, 0.0 }
 0xfa9   :  { %2684 = vadd.xlane.f32.xlu1 %v2683_v50  ;;  %2681 = vadd.xlane.f32.xlu0 %v2680_v44 }
 0xfef   :  { %v2640_v48 = vpop.xlane.xlu0 %2639 }
 0xff0   :  { %v2658_v56 = vsub.f32 %v2626_v8, %v2640_v48 }
 0xff1   :  { %v2643_v57 = vpop.xlane.xlu1 %2642 }
 0xff2   :  { %v2668_v58 = vmul.f32 1.442695, %v2658_v56  ;;  %v2659_v59 = vsub.f32 %v2627_v13, %v2643_v57 }
 0xff4   :  { %4394 = vpow2.f32 %v2668_v58  ;;  %v2670_v60 = vmul.f32 1.442695, %v2659_v59 }
 0xff5   :  { %v2649_v61 = vpop.xlane.xlu1 %2648  ;;  %v2646_v62 = vpop.xlane.xlu0 %2645 }
 0xff6   :  { %4396 = vpow2.f32 %v2670_v60  ;;  %v2661_v63 = vsub.f32 %v2629_v19, %v2649_v61  ;;  %v2660_v0 = vsub.f32 %v2628_v45, %v2646_v62 }
 0xff8   :  { %v2674_v1 = vmul.f32 1.442695, %v2661_v63  ;;  %v2672_v2 = vmul.f32 1.442695, %v2660_v0 }
 0xff9   :  { %v2655_v3 = vpop.xlane.xlu1 %2654  ;;  %v2652_v4 = vpop.xlane.xlu0 %2651 }
 0xffa   :  { %4398 = vpow2.f32 %v2674_v1  ;;  %v2663_v5 = vsub.f32 %v2631_v33, %v2655_v3  ;;  %v2662_v6 = vsub.f32 %v2630_v32, %v2652_v4 }
 0xffb   :  { %4400 = vpow2.f32 %v2672_v2 }
 0xffc   :  { %v2678_v7 = vmul.f32 1.442695, %v2663_v5  ;;  %v2676_v8 = vmul.f32 1.442695, %v2662_v6  ;;  %v4336_v5 = vld [vmem:[%s5241_s5 + $0x10] sm:$0xff]  }
 0xffd   :  { %v2797_v9 = vpop.permute.xlu1 %2796  ;;  %v2721_v10 = vpop.permute.xlu0 %2720 }
 0xffe   :  { %v4395_v12 = vpop.eup %4394  ;;  %4402 = vpow2.f32 %v2678_v7  ;;  %4189 = vmatpush3.msra.mxu1 %v2721_v10  ;;  %4194 = vmatpush3.msra.mxu0 %v2797_v9  ;;  %v4337_v9 = vld [vmem:[%s5241_s5 + $0x18] sm:$0xff]  }
 0xfff   :  { %4404 = vpow2.f32 %v2676_v8  ;;  %v2686_v13 = vsel %vm246_vm5, %v4395_v12, 0.0  ;;  %4198 = vmatprep.subr.mxu1 %v4459_v11  ;;  %4203 = vmatprep.subr.mxu0 %v4459_v11 }
0x1000   :  { %v4397_v14 = vpop.eup %4396  ;;  %2687 = vadd.xlane.f32.xlu0 %v2686_v13 }
0x1001   :  { %v2689_v15 = vsel %vm246_vm5, %v4397_v14, 0.0  ;;  %v2873_v28 = vpop.permute.xlu1 %2872  ;;  %v2949_v31 = vpop.permute.xlu0 %2948 }
0x1002   :  { %2690 = vadd.xlane.f32.xlu1 %v2689_v15 }
0x1004   :  { %v4399_v16 = vpop.eup %4398 }
0x1005   :  { %v4401_v41 = vpop.eup %4400  ;;  %v2695_v45 = vsel %vm246_vm5, %v4399_v16, 0.0  ;;  %v3025_v32 = vpop.permute.xlu1 %3024 }
0x1006   :  { %2696 = vadd.xlane.f32.xlu1 %v2695_v45  ;;  %v2692_v19 = vsel %vm246_vm5, %v4401_v41, 0.0  ;;  %v3101_v33 = vpop.permute.xlu0 %3100 }
0x1007   :  { %2693 = vadd.xlane.f32.xlu0 %v2692_v19 }
0x1008   :  { %v5070_v20 = vpop.eup %4402 }
0x1009   :  { %v5072_v22 = vpop.eup %4404  ;;  %v2701_v26 = vsel %vm246_vm5, %v5070_v20, 0.0 }
0x100a   :  { %2702 = vadd.xlane.f32.xlu1 %v2701_v26  ;;  %v2698_v27 = vsel %vm246_vm5, %v5072_v22, 0.0 }
0x100b   :  { %2699 = vadd.xlane.f32.xlu0 %v2698_v27 }
0x101b   :  { %3176 = vrot.lane.b32.xlu1 %v4966_v52, %s4465_s14 }
0x1021   :  { %3252 = vrot.lane.b32.xlu0 %v4964_v51, %s4465_s14 }
0x1036   :  { %v2685_v34 = vpop.xlane.xlu1 %2684  ;;  %v2682_v37 = vpop.xlane.xlu0 %2681 }
0x1037   :  { %4406 = vrcp.f32 %v2685_v34 }
0x1038   :  { %4408 = vrcp.f32 %v2682_v37 }
0x1041   :  { %v4407_v38 = vpop.eup %4406 }
0x1042   :  { %v4409_v30 = vpop.eup %4408  ;;  %v2713_v54 = vmul.f32 %v4407_v38, %v5058_v39 }
0x1043   :  { %v2712_v18 = vmul.f32 %v4409_v30, %v5056_v43 }
0x1044   :  { %4196 = vmatmul.mubr.msk.f32.vlgmr.msra.gmra.mrb[36].mxu0 %vm246_vm5, %v2713_v54 }
0x1045   :  { %4191 = vmatmul.mubr.msk.f32.vlgmr.msra.gmra.mrb[34].mxu1 %vm246_vm5, %v2712_v18  ;;  %4204 = vmatpush3.msra.mxu0 %v2949_v31 }
0x1046   :  { %4199 = vmatpush3.msra.mxu1 %v2873_v28  ;;  %4200 = vmatprep.mubr.msk.f32.mxu1 %vm4460_vm3, %v4459_v11 }
0x1047   :  { %4208 = vmatprep.subr.mxu1 %v4459_v11  ;;  %4205 = vmatprep.mubr.msk.f32.mxu0 %vm4460_vm3, %v4459_v11 }
0x1048   :  { %4213 = vmatprep.subr.mxu0 %v4459_v11 }
0x108d   :  { %v2688_v51 = vpop.xlane.xlu0 %2687 }
0x108e   :  { %4410 = vrcp.f32 %v2688_v51 }
0x108f   :  { %v2691_v52 = vpop.xlane.xlu1 %2690 }
0x1090   :  { %4412 = vrcp.f32 %v2691_v52 }
0x1093   :  { %v2697_v29 = vpop.xlane.xlu1 %2696 }
0x1094   :  { %4414 = vrcp.f32 %v2697_v29  ;;  %v2694_v42 = vpop.xlane.xlu0 %2693 }
0x1095   :  { %4416 = vrcp.f32 %v2694_v42 }
0x1097   :  { %v2703_v40 = vpop.xlane.xlu1 %2702 }
0x1098   :  { %v4411_v55 = vpop.eup %4410  ;;  %4418 = vrcp.f32 %v2703_v40  ;;  %v2700_v43 = vpop.xlane.xlu0 %2699 }
0x1099   :  { %v2714_v39 = vmul.f32 %v4411_v55, %v4395_v12  ;;  %4420 = vrcp.f32 %v2700_v43  ;;  %v5139_v55 = vld [vmem:[%s5244_s8 + $0x10] sm:$0xff] }
0x109a   :  { %v4413_v50 = vpop.eup %4412  ;;  %v3367_v43 = vrot.slane %v5139_v55, %v1598_v17 }
0x109b   :  { %v2715_v44 = vmul.f32 %v4413_v50, %v4397_v14  ;;  %4201 = vmatmul.mubr.msk.f32.vlgmr.msra.gmra.mrb[36].mxu1 %vm246_vm5, %v2714_v39  ;;  %v3177_v61 = vpop.permute.xlu1 %3176 }
0x109c   :  { %4209 = vmatpush3.msra.mxu1 %v3025_v32  ;;  %4210 = vmatprep.mubr.msk.f32.mxu1 %vm4460_vm3, %v4459_v11  ;;  %v3253_v59 = vpop.permute.xlu0 %3252 }
0x109d   :  { %4206 = vmatmul.mubr.msk.f32.vlgmr.msra.gmra.mrb[38].mxu0 %vm246_vm5, %v2715_v44  ;;  %4218 = vmatprep.subr.mxu1 %v4459_v11 }
0x109e   :  { %v4415_v48 = vpop.eup %4414  ;;  %4214 = vmatpush3.msra.mxu0 %v3101_v33  ;;  %4215 = vmatprep.mubr.msk.f32.mxu0 %vm4460_vm3, %v4459_v11 }
0x109f   :  { %v4417_v56 = vpop.eup %4416  ;;  %v2717_v57 = vmul.f32 %v4415_v48, %v4399_v16  ;;  %4223 = vmatprep.subr.mxu0 %v4459_v11 }
0x10a0   :  { %v2716_v58 = vmul.f32 %v4417_v56, %v4401_v41 }
0x10a1   :  { %4216 = vmatmul.mubr.msk.f32.vlgmr.msra.gmra.mrb[40].mxu0 %vm246_vm5, %v2717_v57 }
0x10a2   :  { %v4419_v60 = vpop.eup %4418  ;;  %4211 = vmatmul.mubr.msk.f32.vlgmr.msra.gmra.mrb[38].mxu1 %vm246_vm5, %v2716_v58  ;;  %4224 = vmatpush3.msra.mxu0 %v3253_v59 }
0x10a3   :  { %v4421_v62 = vpop.eup %4420  ;;  %v2719_v63 = vmul.f32 %v4419_v60, %v5070_v20  ;;  %4219 = vmatpush3.msra.mxu1 %v3177_v61  ;;  %4220 = vmatprep.mubr.msk.f32.mxu1 %vm4460_vm3, %v4459_v11 }
0x10a4   :  { %v2718_v0 = vmul.f32 %v4421_v62, %v5072_v22  ;;  %4225 = vmatprep.mubr.msk.f32.mxu0 %vm4460_vm3, %v4459_v11  ;;  %4228 = vmatprep.subr.bf16.mxu1 %v4459_v11 }
0x10a5   :  { %4226 = vmatmul.mubr.msk.f32.vlgmr.msra.gmra.mrb[42].mxu0 %vm246_vm5, %v2719_v63  ;;  %4236 = vmatprep.subr.bf16.mxu0 %v4459_v11 }
0x10a6   :  { %4221 = vmatmul.mubr.msk.f32.vlgmr.msra.gmra.mrb[40].mxu1 %vm246_vm5, %v2718_v0  ;;  %4240 = vmatprep.mubr.msk.bf16.mxu0 %vm4460_vm3, %v4459_v11 }
0x10a7   :  { %4232 = vmatprep.mubr.msk.bf16.mxu1 %vm4460_vm3, %v4459_v11  ;;  %4229 = vmatpush3.bf16.msra.mxu1 %v4336_v5 }
0x10a8   :  { %4230 = vmatprep.subr.bf16.mxu1 %v4459_v11 }
0x10ab   :  { %4231 = vmatpush3.bf16.msra.mxu1 %v4337_v9 }
0x10ac   :  { %4244 = vmatprep.subr.bf16.mxu1 %v4459_v11 }
0x1117   :  { %v2868_v1 = vpop.f32.mrb[36].mxu0 }
0x1118   :  { %v2792_v2 = vpop.f32.mrb[34].mxu1  ;;  %v4197_v3 = vpop.f32.mrb[37].mxu0 }
0x1119   :  { %v4192_v4 = vpop.f32.mrb[35].mxu1 }
0x116e   :  { %v2944_v6 = vpop.f32.mrb[36].mxu1 }
0x116f   :  { %v4202_v7 = vpop.f32.mrb[37].mxu1 }
0x1170   :  { %v3020_v8 = vpop.f32.mrb[38].mxu0 }
0x1171   :  { %v4309_v10 = vpack.i.bf16 %v3020_v8, %v2944_v6  ;;  %v4207_v12 = vpop.f32.mrb[39].mxu0 }
0x1172   :  { %v3455_v12 = vrot.slane %v5139_v55, %v1687_v46 }
0x1173   :  { %4310 = vrot.lane.b32.xlu1 %v4309_v10, %s4466_s19 }
0x1174   :  { %v3172_v13 = vpop.f32.mrb[40].mxu0 }
0x1175   :  { %v3096_v14 = vpop.f32.mrb[38].mxu1  ;;  %v4217_v15 = vpop.f32.mrb[41].mxu0 }
0x1176   :  { %v4314_v16 = vpack.i.bf16 %v3172_v13, %v3096_v14  ;;  %v4212_v41 = vpop.f32.mrb[39].mxu1  ;;  %v3461_v15 = vrot.slane %v5139_v55, %v1693_v47 }
0x1177   :  { %v3467_v41 = vrot.slane %v5139_v55, %v1699_v49 }
0x1178   :  { %4315 = vrot.lane.b32.xlu0 %v4314_v16, %s4467_s20  ;;  %v3324_v45 = vpop.f32.mrb[42].mxu0 }
0x1179   :  { %v3248_v19 = vpop.f32.mrb[40].mxu1  ;;  %v4227_v20 = vpop.f32.mrb[43].mxu0 }
0x117a   :  { %v4319_v22 = vpack.i.bf16 %v3324_v45, %v3248_v19  ;;  %v4222_v26 = vpop.f32.mrb[41].mxu1 }
0x117c   :  { %4320 = vrot.lane.b32.xlu1 %v4319_v22, %s4468_s0 }
0x11e5   :  { %v4311_v27 = vpop.permute.xlu1 %4310 }
0x11e6   :  { %v4313_v31 = vunpack.i.h.bf16 %v4311_v27  ;;  %v4312_v32 = vunpack.i.l.bf16 %v4311_v27 }
0x11e8   :  { %v3353_v38 = vsel %vm246_vm5, %v2868_v1, %v4313_v31  ;;  %v3352_v30 = vsel %vm246_vm5, %v2792_v2, %v4312_v32 }
0x11ea   :  { %v4316_v28 = vpop.permute.xlu0 %4315 }
0x11eb   :  { %v4318_v33 = vunpack.i.h.bf16 %v4316_v28  ;;  %v4317_v34 = vunpack.i.l.bf16 %v4316_v28 }
0x11ed   :  { %v3355_v51 = vsel %vm1585_vm7, %v3353_v38, %v4318_v33  ;;  %v3354_v52 = vsel %vm1585_vm7, %v3352_v30, %v4317_v34 }
0x11ee   :  { %v4321_v37 = vpop.permute.xlu1 %4320 }
0x11ef   :  { %v4323_v54 = vunpack.i.h.bf16 %v4321_v37  ;;  %v4322_v18 = vunpack.i.l.bf16 %v4321_v37 }
0x11f1   :  { %v3357_v29 = vsel %vm1588_vm8, %v3355_v51, %v4323_v54  ;;  %v3356_v42 = vsel %vm1588_vm8, %v3354_v52, %v4322_v18  ;;  %v4338_v51 = vld [vmem:[%s5242_s6 + $0x10] sm:$0xff]   ;;  %v4339_v52 = vld [vmem:[%s5242_s6 + $0x18] sm:$0xff]  }
0x11f2   :  { %v3358_v40 = vpack.c.bf16 %v3357_v29, %v3356_v42  ;;  %4237 = vmatpush3.bf16.msra.mxu0 %v4338_v51  ;;  %v4340_v29 = vld [vmem:[%s5243_s7 + $0x20] sm:$0xff]   ;;  %v4341_v42 = vld [vmem:[%s5243_s7 + $0x28] sm:$0xff]  }
0x11f3   :  { %4238 = vmatprep.subr.bf16.mxu0 %v4459_v11 }
0x11f4   :  { %4233 = vmatmul.mubr.msk.bf16.vlgmr.msra.gmra.mrb[44].mxu1 %vm185_vm4, %v3358_v40 }
0x11f5   :  { %4252 = vmatprep.mubr.msk.bf16.mxu1 %vm4460_vm3, %v4459_v11  ;;  %4245 = vmatpush3.bf16.msra.mxu1 %v4340_v29 }
0x11f6   :  { %4239 = vmatpush3.bf16.msra.mxu0 %v4339_v52  ;;  %4246 = vmatprep.subr.bf16.mxu1 %v4459_v11 }
0x11f7   :  { %4256 = vmatprep.subr.bf16.mxu0 %v4459_v11 }
0x11f9   :  { %4247 = vmatpush3.bf16.msra.mxu1 %v4341_v42  ;;  %v3693_v42 = vrot.slane %v5139_v55, %v1922_v21 }
0x11fa   :  { %4248 = vmatprep.subr.bf16.mxu1 %v4459_v11 }
0x12c7   :  { %v3417_v39 = vpop.f32.mrb[44].mxu1 }
0x12c8   :  { %v3418_v50 = vadd.f32 %v3417_v39, %v3367_v43  ;;  %v4234_v44 = vpop.f32.mrb[45].mxu1 }
0x12c9   :  { %v3420_v48 = vpop.f32.mrb[46].mxu1 }
0x12ca   :  { %v3421_v56 = vadd.f32 %v3420_v48, %v3367_v43  ;;  %v4235_v57 = vpop.f32.mrb[47].mxu1  ;;  %v3424_v58 = vadd.f32 %v3418_v50, %v4916_v35 }
0x12cb   :  { %v3499_v57 = vrot.slane %v5139_v55, %v1731_v23  ;;  %v4342_v23 = vld [vmem:[%s5243_s7 + $0x30] sm:$0xff]  }
0x12cc   :  { %v3426_v59 = vsel %vm185_vm4, %v3424_v58, 0.0  ;;  %v3425_v60 = vadd.f32 %v3421_v56, %v4918_v36  ;;  %4249 = vmatpush3.bf16.msra.mxu1 %v4342_v23 }
0x12cd   :  { %3427 = vadd.xlane.f32.xlu0 %v3426_v59  ;;  %4250 = vmatprep.subr.bf16.mxu1 %v4459_v11 }
0x12ce   :  { %v3429_v61 = vsel %vm185_vm4, %v3425_v60, 0.0 }
0x12cf   :  { %3430 = vadd.xlane.f32.xlu1 %v3429_v61 }
0x135a   :  { %v3428_v62 = vpop.xlane.xlu0 %3427 }
0x135b   :  { %v3432_v63 = vmul.f32 0.03125, %v3428_v62  ;;  %v3505_v62 = vrot.slane %v5139_v55, %v1737_v25  ;;  %v4343_v25 = vld [vmem:[%s5243_s7 + $0x38] sm:$0xff]  }
0x135c   :  { %v3431_v0 = vpop.xlane.xlu1 %3430  ;;  %4251 = vmatpush3.bf16.msra.mxu1 %v4343_v25 }
0x135d   :  { %v3434_v17 = vsub.f32 %v3424_v58, %v3432_v63  ;;  %v3433_v1 = vmul.f32 0.03125, %v3431_v0 }
0x135f   :  { %v3435_v2 = vsub.f32 %v3425_v60, %v3433_v1  ;;  %v3436_v3 = vmul.f32 %v3434_v17, %v3434_v17 }
0x1361   :  { %v3438_v4 = vsel %vm185_vm4, %v3436_v3, 0.0  ;;  %v3437_v5 = vmul.f32 %v3435_v2, %v3435_v2 }
0x1362   :  { %3439 = vadd.xlane.f32.xlu0 %v3438_v4 }
0x1363   :  { %v3441_v35 = vsel %vm185_vm4, %v3437_v5, 0.0 }
0x1366   :  { %3442 = vadd.xlane.f32.xlu0 %v3441_v35 }
0x13ef   :  { %v3440_v6 = vpop.xlane.xlu0 %3439 }
0x13f0   :  { %v3444_v36 = vmul.f32 0.03125, %v3440_v6 }
0x13f2   :  { %v3446_v7 = vadd.f32 1e-05, %v3444_v36 }
0x13f3   :  { %v3443_v8 = vpop.xlane.xlu0 %3442 }
0x13f4   :  { %4422 = vrsqrt.f32 %v3446_v7  ;;  %v3445_v9 = vmul.f32 0.03125, %v3443_v8 }
0x13f6   :  { %v3447_v10 = vadd.f32 1e-05, %v3445_v9 }
0x13f8   :  { %4424 = vrsqrt.f32 %v3447_v10  ;;  %v3890_v10 = vld [vmem:[%s5244_s8 + $0x18] ss:$0 sm:$0xff] }
0x13fe   :  { %v4423_v13 = vpop.eup %4422 }
0x13ff   :  { %v3450_v14 = vmul.f32 %v4423_v13, %v3434_v17 }
0x1401   :  { %v3456_v16 = vmul.f32 %v3455_v12, %v3450_v14 }
0x1402   :  { %v4425_v45 = vpop.eup %4424 }
0x1403   :  { %v3462_v19 = vadd.f32 %v3461_v15, %v3456_v16  ;;  %v3451_v20 = vmul.f32 %v4425_v45, %v3435_v2  ;;  %v3878_v2 = vld [vmem:[%s5245_s9 + $0x1] ss:$0 sm:$0xff] }
0x1405   :  { %v3468_v22 = vadd.f32 %v3467_v41, %v3462_v19  ;;  %v3457_v26 = vmul.f32 %v3455_v12, %v3451_v20 }
0x1407   :  { %v3470_v27 = vsel %vm185_vm4, %v3468_v22, 0.0  ;;  %v3463_v28 = vadd.f32 %v3461_v15, %v3457_v26 }
0x1408   :  { %3471 = vadd.xlane.f32.xlu1 %v3470_v27 }
0x1409   :  { %v3469_v46 = vadd.f32 %v3467_v41, %v3463_v28 }
0x140b   :  { %v3473_v31 = vsel %vm185_vm4, %v3469_v46, 0.0 }
0x140c   :  { %3474 = vadd.xlane.f32.xlu0 %v3473_v31 }
0x1495   :  { %v3472_v32 = vpop.xlane.xlu1 %3471 }
0x1496   :  { %v3476_v47 = vmul.f32 0.03125, %v3472_v32 }
0x1498   :  { %v3478_v33 = vsub.f32 %v3468_v22, %v3476_v47 }
0x1499   :  { %v3475_v34 = vpop.xlane.xlu0 %3474 }
0x149a   :  { %v3477_v37 = vmul.f32 0.03125, %v3475_v34  ;;  %v3480_v38 = vmul.f32 %v3478_v33, %v3478_v33 }
0x149c   :  { %v3479_v49 = vsub.f32 %v3469_v46, %v3477_v37  ;;  %v3482_v30 = vsel %vm185_vm4, %v3480_v38, 0.0  ;;  %v4344_v38 = vld [vmem:[%s5246_s10] sm:$0xff]  }
0x149d   :  { %3483 = vadd.xlane.f32.xlu1 %v3482_v30 }
0x149e   :  { %v3481_v54 = vmul.f32 %v3479_v49, %v3479_v49 }
0x14a0   :  { %v3485_v18 = vsel %vm185_vm4, %v3481_v54, 0.0 }
0x14a1   :  { %3486 = vadd.xlane.f32.xlu0 %v3485_v18 }
0x152a   :  { %v3484_v40 = vpop.xlane.xlu1 %3483 }
0x152b   :  { %v3488_v43 = vmul.f32 0.03125, %v3484_v40 }
0x152d   :  { %v3490_v39 = vadd.f32 1e-05, %v3488_v43 }
0x152e   :  { %v3487_v50 = vpop.xlane.xlu0 %3486 }
0x152f   :  { %4426 = vrsqrt.f32 %v3490_v39  ;;  %v3489_v44 = vmul.f32 0.03125, %v3487_v50 }
0x1531   :  { %v3491_v48 = vadd.f32 1e-05, %v3489_v44 }
0x1533   :  { %4428 = vrsqrt.f32 %v3491_v48 }
0x1539   :  { %v4427_v56 = vpop.eup %4426 }
0x153a   :  { %v3494_v58 = vmul.f32 %v4427_v56, %v3478_v33 }
0x153c   :  { %v3500_v60 = vmul.f32 %v3499_v57, %v3494_v58 }
0x153d   :  { %v4429_v59 = vpop.eup %4428 }
0x153e   :  { %v3495_v61 = vmul.f32 %v4429_v59, %v3479_v49  ;;  %v3506_v0 = vadd.f32 %v3505_v62, %v3500_v60  ;;  %v4345_v49 = vld [vmem:[%s5246_s10 + $0x8] sm:$0xff]   ;;  %v3896_v59 = vld [vmem:[%s5247_s11] ss:$0 sm:$0xff] }
0x1540   :  { %v3501_v63 = vmul.f32 %v3499_v57, %v3495_v61 }
0x1542   :  { %v3507_v17 = vadd.f32 %v3505_v62, %v3501_v63 }
0x1544   :  { %v3508_v1 = vpack.c.bf16 %v3507_v17, %v3506_v0 }
0x1546   :  { %4241 = vmatmul.mubr.msk.bf16.vlgmr.msra.gmra.mrb[44].mxu0 %vm185_vm4, %v3508_v1 }
0x1547   :  { %4260 = vmatprep.mubr.msk.bf16.mxu0 %vm4460_vm3, %v4459_v11  ;;  %4257 = vmatpush3.bf16.msra.mxu0 %v4344_v38 }
0x1548   :  { %4258 = vmatprep.subr.bf16.mxu0 %v4459_v11  ;;  %v3699_v11 = vrot.slane %v5139_v55, %v1928_v24 }
0x154b   :  { %4259 = vmatpush3.bf16.msra.mxu0 %v4345_v49 }
0x1619   :  { %v3571_v3 = vpop.f32.mrb[44].mxu0 }
0x161a   :  { %v3572_v4 = vadd.f32 %v3878_v2, %v3571_v3  ;;  %v4242_v5 = vpop.f32.mrb[45].mxu0 }
0x161b   :  { %v3574_v35 = vpop.f32.mrb[46].mxu0 }
0x161c   :  { %v3575_v6 = vadd.f32 %v3878_v2, %v3574_v35  ;;  %v4243_v36 = vpop.f32.mrb[47].mxu0  ;;  %v3578_v7 = vmax.f32 %v3572_v4, 0.0 }
0x161e   :  { %v3579_v8 = vmax.f32 %v3575_v6, 0.0 }
0x1620   :  { %v3580_v9 = vpack.c.bf16 %v3579_v8, %v3578_v7 }
0x1622   :  { %4253 = vmatmul.mubr.msk.bf16.vlgmr.msra.gmra.mrb[48].mxu1 %vm67_vm0, %v3580_v9 }
0x16f5   :  { %v3655_v12 = vpop.f32.mrb[48].mxu1 }
0x16f6   :  { %v3656_v13 = vadd.f32 %v3890_v10, %v3655_v12  ;;  %v4254_v14 = vpop.f32.mrb[49].mxu1 }
0x16f7   :  { %v3658_v15 = vpop.f32.mrb[50].mxu1 }
0x16f8   :  { %v3662_v16 = vadd.f32 %v3656_v13, %v3506_v0  ;;  %v3659_v41 = vadd.f32 %v3890_v10, %v3658_v15  ;;  %v4255_v45 = vpop.f32.mrb[51].mxu1 }
0x16fa   :  { %v3663_v19 = vadd.f32 %v3659_v41, %v3507_v17  ;;  %v3664_v20 = vsel %vm185_vm4, %v3662_v16, 0.0 }
0x16fb   :  { %3665 = vadd.xlane.f32.xlu1 %v3664_v20 }
0x16fc   :  { %v3667_v22 = vsel %vm185_vm4, %v3663_v19, 0.0 }
0x16fd   :  { %3668 = vadd.xlane.f32.xlu0 %v3667_v22 }
0x1788   :  { %v3666_v26 = vpop.xlane.xlu1 %3665 }
0x1789   :  { %v3670_v27 = vmul.f32 0.03125, %v3666_v26 }
0x178a   :  { %v3669_v28 = vpop.xlane.xlu0 %3668 }
0x178b   :  { %v3672_v46 = vsub.f32 %v3662_v16, %v3670_v27  ;;  %v3671_v31 = vmul.f32 0.03125, %v3669_v28 }
0x178d   :  { %v3673_v32 = vsub.f32 %v3663_v19, %v3671_v31  ;;  %v3674_v47 = vmul.f32 %v3672_v46, %v3672_v46 }
0x178f   :  { %v3676_v33 = vsel %vm185_vm4, %v3674_v47, 0.0  ;;  %v3675_v34 = vmul.f32 %v3673_v32, %v3673_v32 }
0x1790   :  { %3677 = vadd.xlane.f32.xlu1 %v3676_v33 }
0x1791   :  { %v3679_v37 = vsel %vm185_vm4, %v3675_v34, 0.0 }
0x1792   :  { %3680 = vadd.xlane.f32.xlu0 %v3679_v37 }
0x181d   :  { %v3678_v30 = vpop.xlane.xlu1 %3677 }
0x181e   :  { %v3682_v54 = vmul.f32 0.03125, %v3678_v30 }
0x181f   :  { %v3681_v18 = vpop.xlane.xlu0 %3680 }
0x1820   :  { %v3684_v51 = vadd.f32 1e-05, %v3682_v54  ;;  %v3683_v52 = vmul.f32 0.03125, %v3681_v18 }
0x1822   :  { %4430 = vrsqrt.f32 %v3684_v51  ;;  %v3685_v29 = vadd.f32 1e-05, %v3683_v52 }
0x1824   :  { %4432 = vrsqrt.f32 %v3685_v29 }
0x182c   :  { %v4431_v40 = vpop.eup %4430 }
0x182d   :  { %v3688_v43 = vmul.f32 %v4431_v40, %v3672_v46 }
0x182e   :  { %v4433_v39 = vpop.eup %4432 }
0x182f   :  { %v3694_v50 = vmul.f32 %v3693_v42, %v3688_v43  ;;  %v3689_v44 = vmul.f32 %v4433_v39, %v3673_v32 }
0x1831   :  { %v3695_v48 = vmul.f32 %v3693_v42, %v3689_v44  ;;  %v3700_v56 = vadd.f32 %v3699_v11, %v3694_v50 }
0x1833   :  { %v3701_v57 = vadd.f32 %v3699_v11, %v3695_v48 }
0x1835   :  { %v3702_v58 = vpack.c.bf16 %v3701_v57, %v3700_v56 }
0x1837   :  { %4261 = vmatmul.mubr.msk.bf16.vlgmr.msra.gmra.mrb[48].mxu0 %vm185_vm4, %v3702_v58 }
0x190a   :  { %v3763_v21 = vpop.f32.mrb[48].mxu0 }
0x190b   :  { %v3764_v60 = vadd.f32 %v3896_v59, %v3763_v21  ;;  %v4262_v61 = vpop.f32.mrb[49].mxu0 }
0x190c   :  { %v3766_v62 = vpop.f32.mrb[50].mxu0 }
0x190d   :  { %3770 = vst [vmem:[#allocation2] sm:$0xff] %v3764_v60  ;;  %v3767_v53 = vadd.f32 %v3896_v59, %v3766_v62  ;;  %v4263_v63 = vpop.f32.mrb[51].mxu0 }
0x190f   :  { %3771 = vst [vmem:[#allocation2 + $0x8] sm:$0xff] %v3767_v53 }
0x1910   :  { %4445 = shalt.err (!%p4442_p4)
}
0x1911   :  { %s4446_s5 = scalar_lea.hbm %s5248_s12, 256 }
0x1912   :  { %p4447_p5 = scmp.ne.s32.totalorder %s5248_s12, %s4446_s5  ;;  %p4450_p6 = scmp.lt.u32.totalorder %s4446_s5, %s5248_s12 }
0x1914   :  { %p4452_p7 = pnand %p4450_p6, %p4447_p5 }
0x1916   :  { %4455 = shalt.err (!%p4452_p7)
}
0x1917   :  { %s4470_s16 = smov 128  }
0x1918   :  { %3783 = dma.vmem_to_hbm [thread:$0]  %s3778_s2, 256, %s5248_s12, [#allocation3], %s4470_s16, %s4470_s16, %s4466_s19  }
0x1919   :  { %4456 = dma.done.wait [#allocation3], 256  }
0x191a   :  { %4457 = vsyncadd [#allocation3], 4294967040 }
0x191b   :  { %3787 = vsyncpa [#allocation3], 1 }

</bundles_post_ra>
